<compile_context>
chip_gen: v5e
topology: v5e:2x2
jax: 0.10.0
libtpu: 0.0.40
codegen_flags: <defaults>
</compile_context>

<pallas_src>
import jax
import jax.numpy as jnp
from jax.experimental import pallas as pl
from jax.experimental.pallas import tpu as pltpu

EPS = 1e-5


def _ceil_to(x, m):
    return ((x + m - 1) // m) * m


# ----------------------------- Pallas kernel ------------------------------ #
def make_basic_block_kernel(H, W, planes, Bt, has_proj):
    HW = H * W

    def kernel(x_ref, w1_ref, w2_ref, *rest):
        if has_proj:
            ws_ref, aff_ref, out_ref = rest
        else:
            aff_ref, out_ref = rest

        w1 = w1_ref[...]                       # (Pp, 3*Cp)
        w2 = w2_ref[...]                       # (planes, 3*Pp)
        ws = ws_ref[...] if has_proj else None  # (planes, Cp)
        aff = aff_ref[...]                     # (Pp, 4|6): [g1,b1,g2,b2,(gs,bs)]

        # ---- hoisted per-step constants (shared by all Bt images, both convs)
        lane = jax.lax.broadcasted_iota(jnp.int32, (1, HW), 1)
        up_keep = lane >= W                    # valid lanes for the x[h-1] tap
        dn_keep = lane < (HW - W)              # valid lanes for the x[h+1] tap
        ones_nk = jnp.ones((HW, 128), jnp.float32)   # MXU stat reducer (1 lane tile)
        inv_n = 1.0 / HW

        def taps(v):
            # v: (C, HW) with C a multiple of 8.  Build the 3 H-taps of a (3,1)
            # conv with padding (1,0) as one (3C, HW) tensor:
            # [x[h-1]; x[h]; x[h+1]] stacked on channels (sublane-aligned concat).
            up = jnp.where(up_keep, pltpu.roll(v, shift=W, axis=1), 0.0)
            dn = jnp.where(dn_keep, pltpu.roll(v, shift=HW - W, axis=1), 0.0)
            return jnp.concatenate([up, v, dn], axis=0)

        def inorm(v, col):
            # GroupNorm(num_groups == channels) == per-channel norm over (H, W),
            # biased variance, eps=1e-5.  Single-pass stats computed on the MXU
            # (dot against a ones column-block) instead of XLU cross-lane sums.
            c = v.shape[0]
            g = aff[0:c, col:col + 1]
            b = aff[0:c, col + 1:col + 2]
            s1 = jnp.dot(v, ones_nk, preferred_element_type=jnp.float32)[:, 0:1]
            s2 = jnp.dot(v * v, ones_nk, preferred_element_type=jnp.float32)[:, 0:1]
            mean = s1 * inv_n
            var = jnp.maximum(s2 * inv_n - mean * mean, 0.0)   # clamp f32 cancellation
            return (v - mean) * jax.lax.rsqrt(var + EPS) * g + b

        def one_image(bi, carry):
            x = x_ref[bi]                                           # (Cp, HW)

            # conv1 (3,1) -> bn1 -> relu   (fused 3-tap matmul, K = 3*Cp)
            h = jnp.dot(w1, taps(x), preferred_element_type=jnp.float32)
            h = jax.nn.relu(inorm(h, 0))                            # (Pp, HW)

            # conv2 (3,1) -> bn2
            h = jnp.dot(w2, taps(h), preferred_element_type=jnp.float32)
            h = inorm(h, 2)                                         # (planes, HW)

            # shortcut: identity, or 1x1 conv -> groupnorm (projection)
            if has_proj:
                sc = inorm(jnp.dot(ws, x, preferred_element_type=jnp.float32), 4)
            else:
                sc = x[0:planes, :]                                 # Cin == planes

            out_ref[bi] = jax.nn.relu(h + sc)
            return carry

        jax.lax.fori_loop(0, Bt, one_image, 0, unroll=True)

    return kernel


def _pick_bt(B, bytes_per_image, target_block_bytes=2 << 20, max_bt=32):
    """Images per grid step: whole batch when tiny, else the largest divisor of
    B that keeps the block small and leaves >= 8 grid steps (pipelining + both
    v7x TensorCores)."""
    if B <= 8:
        return B
    cap = int(max(1, min(max_bt, B // 8,
                         target_block_bytes // max(bytes_per_image, 1))))
    for bt in range(cap, 0, -1):
        if B % bt == 0:
            return bt
    return 1


# ------------------------------- wrapper ----------------------------------- #
def basic_block_forward(x_nchw, params, stride=1):
    """x_nchw: (B, C_in, H, W) float32 (or (B, C_in, H) -> unsqueezed)."""
    if x_nchw.ndim == 3:
        x_nchw = x_nchw[..., None]
    assert stride == 1, "TODO(synk): stride != 1 not implemented"

    B, Cin, H, W = x_nchw.shape
    HW = H * W
    planes = params['w1'].shape[0]
    has_proj = (stride != 1) or (Cin != planes)
    if not has_proj:
        assert Cin == planes, "identity shortcut requires Cin == planes"

    Cp = _ceil_to(Cin, 8)       # padded input channels
    Pp = _ceil_to(planes, 8)    # padded mid channels (conv1 output)

    # NCHW -> (B, C, H*W) is a free reshape; zero channel-padding keeps the
    # in-kernel tap concat sublane-aligned and the matmul K a multiple of 8.
    x2 = x_nchw.reshape(B, Cin, HW).astype(jnp.float32)
    if Cp != Cin:
        x2 = jnp.pad(x2, ((0, 0), (0, Cp - Cin), (0, 0)))

    # Fold the 3 H-taps of each (3,1) conv into a single (Cout, 3*Cin_pad)
    # weight whose K ordering matches taps(): [tap x[h-1] | tap x[h] | tap x[h+1]].
    w1k = jnp.pad(params['w1'][:, :, :, 0],
                  ((0, Pp - planes), (0, Cp - Cin), (0, 0)))        # (Pp, Cp, 3)
    w1_aug = w1k.transpose(0, 2, 1).reshape(Pp, 3 * Cp)
    w2k = jnp.pad(params['w2'][:, :, :, 0],
                  ((0, 0), (0, Pp - planes), (0, 0)))               # (planes, Pp, 3)
    w2_aug = w2k.transpose(0, 2, 1).reshape(planes, 3 * Pp)

    def pad1(v):
        return jnp.pad(v, (0, Pp - v.shape[0]))

    cols = [pad1(params['g1']), pad1(params['b1']),
            pad1(params['g2']), pad1(params['b2'])]
    if has_proj:
        ws = jnp.pad(params['ws'][:, :, 0, 0], ((0, 0), (0, Cp - Cin)))  # (planes, Cp)
        cols += [pad1(params['gs']), pad1(params['bs'])]
    aff = jnp.stack(cols, axis=1).astype(jnp.float32)               # (Pp, 4|6)

    bytes_per_image = 4 * HW * (Cp + planes)
    Bt = _pick_bt(B, bytes_per_image)
    grid = (B // Bt,)

    const_arrays = [w1_aug, w2_aug] + ([ws] if has_proj else []) + [aff]
    const_specs = [pl.BlockSpec(a.shape, lambda b: (0, 0)) for a in const_arrays]

    # Size the scoped VMEM explicitly (double-buffered in+out blocks + weights),
    # capped at 64 MiB so the same choice is safe on v7x's smaller VMEM.
    weight_bytes = 4 * sum(int(a.size) for a in const_arrays)
    block_bytes = 4 * HW * Bt * (Cp + planes)
    vmem_limit = int(min(64 << 20,
                         max(16 << 20, 4 * block_bytes + 4 * weight_bytes + (2 << 20))))

    kernel = make_basic_block_kernel(H, W, planes, Bt, has_proj)
    out = pl.pallas_call(
        kernel,
        out_shape=jax.ShapeDtypeStruct((B, planes, HW), jnp.float32),
        grid=grid,
        in_specs=[pl.BlockSpec((Bt, Cp, HW), lambda b: (b, 0, 0))] + const_specs,
        out_specs=pl.BlockSpec((Bt, planes, HW), lambda b: (b, 0, 0)),
        compiler_params=pltpu.CompilerParams(
            dimension_semantics=("parallel",),
            vmem_limit_bytes=vmem_limit),
    )(x2, *const_arrays)

    return out.reshape(B, planes, H, W)


# --------------------------- parameter creation ----------------------------- #
def init_params(key, in_planes, planes, stride=1):
    ks = jax.random.split(key, 6)

    def conv_w(k, cout, cin, kh, kw):
        fan_in = cin * kh * kw
        return jax.random.normal(k, (cout, cin, kh, kw), jnp.float32) / jnp.sqrt(fan_in)

    def affine(k, c):
        kg, kb = jax.random.split(k)
        g = 1.0 + 0.1 * jax.random.normal(kg, (c,), jnp.float32)
        b = 0.1 * jax.random.normal(kb, (c,), jnp.float32)
        return g, b

    p = dict(
        w1=conv_w(ks[0], planes, in_planes, 3, 1),     # (planes, in_planes, 3, 1)
        w2=conv_w(ks[1], planes, planes, 3, 1),        # (planes, planes, 3, 1)
    )
    p['g1'], p['b1'] = affine(ks[2], planes)
    p['g2'], p['b2'] = affine(ks[3], planes)
    if stride != 1 or in_planes != planes:             # expansion == 1
        p['ws'] = conv_w(ks[4], planes, in_planes, 1, 1)
        p['gs'], p['bs'] = affine(ks[5], planes)
    return p


# --------------------------- pure-JAX reference ----------------------------- #
def reference_forward(x, params, stride=1):
    if x.ndim == 3:
        x = x[..., None]
    planes = params['w1'].shape[0]
    Cin = x.shape[1]
    has_proj = (stride != 1) or (Cin != planes)

    def gn(v, g, b):
        mean = jnp.mean(v, axis=(2, 3), keepdims=True)
        var = jnp.var(v, axis=(2, 3), keepdims=True)
        return ((v - mean) / jnp.sqrt(var + EPS)
                * g[None, :, None, None] + b[None, :, None, None])

    def conv31(v, w, s=1):
        return jax.lax.conv_general_dilated(
            v, w, (s, s), ((1, 1), (0, 0)),
            dimension_numbers=('NCHW', 'OIHW', 'NCHW'))

    out = jax.nn.relu(gn(conv31(x, params['w1'], stride), params['g1'], params['b1']))
    out = gn(conv31(out, params['w2']), params['g2'], params['b2'])
    if has_proj:
        sc = jax.lax.conv_general_dilated(
            x, params['ws'], (stride, stride), 'VALID',
            dimension_numbers=('NCHW', 'OIHW', 'NCHW'))
        sc = gn(sc, params['gs'], params['bs'])
    else:
        sc = x
    return jax.nn.relu(out + sc)


if __name__ == "__main__":
    key = jax.random.PRNGKey(0)
    kx, kp1, kp2 = jax.random.split(key, 3)

    B, H, W = 2, 16, 16
    x = jax.random.normal(kx, (B, 4, H, W), jnp.float32)

    # Config 1: in_planes != planes -> projection shortcut path.
    params = init_params(kp1, 4, 8)
    out = jax.block_until_ready(basic_block_forward(x, params))
    ref = reference_forward(x, params)
    assert out.shape == (B, 8, H, W), out.shape
    assert jnp.allclose(out, ref, atol=1e-4, rtol=1e-4), \
        float(jnp.max(jnp.abs(out - ref)))

    # Config 2: in_planes == planes, stride=1 -> identity shortcut path.
    params2 = init_params(kp2, 4, 4)
    out2 = jax.block_until_ready(basic_block_forward(x, params2))
    ref2 = reference_forward(x, params2)
    assert out2.shape == (B, 4, H, W), out2.shape
    assert jnp.allclose(out2, ref2, atol=1e-4, rtol=1e-4), \
        float(jnp.max(jnp.abs(out2 - ref2)))

    print("KERNEL_OK")
</pallas_src>

<mosaic_0001>
module attributes {stable_mosaic.version = 11 : i64} {
  func.func @kernel(%arg0: i32, %arg1: memref<2x8x256xf32, #tpu.memory_space<vmem>>, %arg2: memref<8x24xf32, #tpu.memory_space<vmem>>, %arg3: memref<8x24xf32, #tpu.memory_space<vmem>>, %arg4: memref<8x8xf32, #tpu.memory_space<vmem>>, %arg5: memref<8x6xf32, #tpu.memory_space<vmem>>, %arg6: memref<2x8x256xf32, #tpu.memory_space<vmem>>) attributes {dimension_semantics = [#tpu.dimension_semantics<parallel>], iteration_bounds = array<i64: 1>, scalar_prefetch = 0 : i64, scratch_operands = 0 : i64, tpu.core_type = #tpu.core_type<tc>, window_params = [{transform_indices = @transform_0, window_bounds = array<i64: 2, 8, 256>}, {pipeline_mode = #tpu.pipeline_mode<synchronous>, transform_indices = @transform_1, window_bounds = array<i64: 8, 24>}, {pipeline_mode = #tpu.pipeline_mode<synchronous>, transform_indices = @transform_2, window_bounds = array<i64: 8, 24>}, {pipeline_mode = #tpu.pipeline_mode<synchronous>, transform_indices = @transform_3, window_bounds = array<i64: 8, 8>}, {pipeline_mode = #tpu.pipeline_mode<synchronous>, transform_indices = @transform_4, window_bounds = array<i64: 8, 6>}, {transform_indices = @transform_5, window_bounds = array<i64: 2, 8, 256>}]} {
    %c0 = arith.constant 0 : index
    %c0_0 = arith.constant 0 : index
    %0 = vector.load %arg2[%c0, %c0_0] : memref<8x24xf32, #tpu.memory_space<vmem>>, vector<8x24xf32>
    %c0_1 = arith.constant 0 : index
    %c0_2 = arith.constant 0 : index
    %1 = vector.load %arg3[%c0_1, %c0_2] : memref<8x24xf32, #tpu.memory_space<vmem>>, vector<8x24xf32>
    %c0_3 = arith.constant 0 : index
    %c0_4 = arith.constant 0 : index
    %2 = vector.load %arg4[%c0_3, %c0_4] : memref<8x8xf32, #tpu.memory_space<vmem>>, vector<8x8xf32>
    %c0_5 = arith.constant 0 : index
    %c0_6 = arith.constant 0 : index
    %3 = vector.load %arg5[%c0_5, %c0_6] : memref<8x6xf32, #tpu.memory_space<vmem>>, vector<8x6xf32>
    %4 = tpu.iota {dimensions = array<i32: 1>} : vector<1x256xi32>
    %c16_i32 = arith.constant 16 : i32
    %5 = vector.broadcast %c16_i32 : i32 to vector<1x256xi32>
    %6 = arith.cmpi sge, %4, %5 : vector<1x256xi32>
    %c240_i32 = arith.constant 240 : i32
    %7 = vector.broadcast %c240_i32 : i32 to vector<1x256xi32>
    %8 = arith.cmpi slt, %4, %7 : vector<1x256xi32>
    %cst = arith.constant 1.000000e+00 : f32
    %9 = vector.broadcast %cst : f32 to vector<256x128xf32>
    %c0_i32 = arith.constant 0 : i32
    %10 = arith.index_cast %c0_i32 : i32 to index
    %c0_7 = arith.constant 0 : index
    %c0_8 = arith.constant 0 : index
    %11 = vector.load %arg1[%10, %c0_7, %c0_8] : memref<2x8x256xf32, #tpu.memory_space<vmem>>, vector<1x8x256xf32>
    %12 = vector.shape_cast %11 : vector<1x8x256xf32> to vector<8x256xf32>
    %c16_i32_9 = arith.constant 16 : i32
    %13 = tpu.dynamic_rotate %12 by %c16_i32_9 dim 1 : vector<8x256xf32>, i32 -> vector<8x256xf32>
    %cst_10 = arith.constant 0.000000e+00 : f32
    %14 = vector.shape_cast %6 : vector<1x256xi1> to vector<1x256xi1>
    %15 = vector.broadcast %14 : vector<1x256xi1> to vector<8x256xi1>
    %16 = vector.broadcast %cst_10 : f32 to vector<8x256xf32>
    %17 = arith.select %15, %13, %16 : vector<8x256xi1>, vector<8x256xf32>
    %c240_i32_11 = arith.constant 240 : i32
    %18 = tpu.dynamic_rotate %12 by %c240_i32_11 dim 1 : vector<8x256xf32>, i32 -> vector<8x256xf32>
    %cst_12 = arith.constant 0.000000e+00 : f32
    %19 = vector.shape_cast %8 : vector<1x256xi1> to vector<1x256xi1>
    %20 = vector.broadcast %19 : vector<1x256xi1> to vector<8x256xi1>
    %21 = vector.broadcast %cst_12 : f32 to vector<8x256xf32>
    %22 = arith.select %20, %18, %21 : vector<8x256xi1>, vector<8x256xf32>
    %23 = tpu.concatenate %17, %12, %22 in 0 : vector<8x256xf32>, vector<8x256xf32>, vector<8x256xf32> -> vector<24x256xf32>
    %cst_13 = arith.constant dense<0.000000e+00> : vector<8x256xf32>
    %24 = tpu.matmul %0, %23, %cst_13 {dimension_numbers = #tpu.dot_dimension_numbers<[1], [0], [0], [1], [0, 0, 1, 1], [], []>} : vector<8x24xf32>, vector<24x256xf32>, vector<8x256xf32> -> vector<8x256xf32>
    %25 = vector.extract_strided_slice %3 {offsets = [0, 0], sizes = [8, 1], strides = [1, 1]} : vector<8x6xf32> to vector<8x1xf32>
    %26 = vector.extract_strided_slice %3 {offsets = [0, 1], sizes = [8, 1], strides = [1, 1]} : vector<8x6xf32> to vector<8x1xf32>
    %cst_14 = arith.constant dense<0.000000e+00> : vector<8x128xf32>
    %27 = tpu.matmul %24, %9, %cst_14 {dimension_numbers = #tpu.dot_dimension_numbers<[1], [0], [0], [1], [0, 0, 1, 1], [], []>} : vector<8x256xf32>, vector<256x128xf32>, vector<8x128xf32> -> vector<8x128xf32>
    %28 = vector.extract_strided_slice %27 {offsets = [0, 0], sizes = [8, 1], strides = [1, 1]} : vector<8x128xf32> to vector<8x1xf32>
    %29 = arith.mulf %24, %24 : vector<8x256xf32>
    %cst_15 = arith.constant dense<0.000000e+00> : vector<8x128xf32>
    %30 = tpu.matmul %29, %9, %cst_15 {dimension_numbers = #tpu.dot_dimension_numbers<[1], [0], [0], [1], [0, 0, 1, 1], [], []>} : vector<8x256xf32>, vector<256x128xf32>, vector<8x128xf32> -> vector<8x128xf32>
    %31 = vector.extract_strided_slice %30 {offsets = [0, 0], sizes = [8, 1], strides = [1, 1]} : vector<8x128xf32> to vector<8x1xf32>
    %cst_16 = arith.constant 3.906250e-03 : f32
    %32 = vector.broadcast %cst_16 : f32 to vector<8x1xf32>
    %33 = arith.mulf %28, %32 : vector<8x1xf32>
    %cst_17 = arith.constant 3.906250e-03 : f32
    %34 = vector.broadcast %cst_17 : f32 to vector<8x1xf32>
    %35 = arith.mulf %31, %34 : vector<8x1xf32>
    %36 = arith.mulf %33, %33 : vector<8x1xf32>
    %37 = arith.subf %35, %36 : vector<8x1xf32>
    %cst_18 = arith.constant 0.000000e+00 : f32
    %38 = vector.broadcast %cst_18 : f32 to vector<8x1xf32>
    %39 = arith.maximumf %37, %38 : vector<8x1xf32>
    %40 = vector.broadcast %33 : vector<8x1xf32> to vector<8x256xf32>
    %41 = arith.subf %24, %40 : vector<8x256xf32>
    %cst_19 = arith.constant 9.99999974E-6 : f32
    %42 = vector.broadcast %cst_19 : f32 to vector<8x1xf32>
    %43 = arith.addf %39, %42 : vector<8x1xf32>
    %44 = math.rsqrt %43 : vector<8x1xf32>
    %45 = vector.broadcast %44 : vector<8x1xf32> to vector<8x256xf32>
    %46 = arith.mulf %41, %45 : vector<8x256xf32>
    %47 = vector.broadcast %25 : vector<8x1xf32> to vector<8x256xf32>
    %48 = arith.mulf %46, %47 : vector<8x256xf32>
    %49 = vector.broadcast %26 : vector<8x1xf32> to vector<8x256xf32>
    %50 = arith.addf %48, %49 : vector<8x256xf32>
    %cst_20 = arith.constant 0.000000e+00 : f32
    %51 = vector.broadcast %cst_20 : f32 to vector<8x256xf32>
    %52 = arith.maximumf %50, %51 : vector<8x256xf32>
    %c16_i32_21 = arith.constant 16 : i32
    %53 = tpu.dynamic_rotate %52 by %c16_i32_21 dim 1 : vector<8x256xf32>, i32 -> vector<8x256xf32>
    %cst_22 = arith.constant 0.000000e+00 : f32
    %54 = vector.shape_cast %6 : vector<1x256xi1> to vector<1x256xi1>
    %55 = vector.broadcast %54 : vector<1x256xi1> to vector<8x256xi1>
    %56 = vector.broadcast %cst_22 : f32 to vector<8x256xf32>
    %57 = arith.select %55, %53, %56 : vector<8x256xi1>, vector<8x256xf32>
    %c240_i32_23 = arith.constant 240 : i32
    %58 = tpu.dynamic_rotate %52 by %c240_i32_23 dim 1 : vector<8x256xf32>, i32 -> vector<8x256xf32>
    %cst_24 = arith.constant 0.000000e+00 : f32
    %59 = vector.shape_cast %8 : vector<1x256xi1> to vector<1x256xi1>
    %60 = vector.broadcast %59 : vector<1x256xi1> to vector<8x256xi1>
    %61 = vector.broadcast %cst_24 : f32 to vector<8x256xf32>
    %62 = arith.select %60, %58, %61 : vector<8x256xi1>, vector<8x256xf32>
    %63 = tpu.concatenate %57, %52, %62 in 0 : vector<8x256xf32>, vector<8x256xf32>, vector<8x256xf32> -> vector<24x256xf32>
    %cst_25 = arith.constant dense<0.000000e+00> : vector<8x256xf32>
    %64 = tpu.matmul %1, %63, %cst_25 {dimension_numbers = #tpu.dot_dimension_numbers<[1], [0], [0], [1], [0, 0, 1, 1], [], []>} : vector<8x24xf32>, vector<24x256xf32>, vector<8x256xf32> -> vector<8x256xf32>
    %65 = vector.extract_strided_slice %3 {offsets = [0, 2], sizes = [8, 1], strides = [1, 1]} : vector<8x6xf32> to vector<8x1xf32>
    %66 = vector.extract_strided_slice %3 {offsets = [0, 3], sizes = [8, 1], strides = [1, 1]} : vector<8x6xf32> to vector<8x1xf32>
    %cst_26 = arith.constant dense<0.000000e+00> : vector<8x128xf32>
    %67 = tpu.matmul %64, %9, %cst_26 {dimension_numbers = #tpu.dot_dimension_numbers<[1], [0], [0], [1], [0, 0, 1, 1], [], []>} : vector<8x256xf32>, vector<256x128xf32>, vector<8x128xf32> -> vector<8x128xf32>
    %68 = vector.extract_strided_slice %67 {offsets = [0, 0], sizes = [8, 1], strides = [1, 1]} : vector<8x128xf32> to vector<8x1xf32>
    %69 = arith.mulf %64, %64 : vector<8x256xf32>
    %cst_27 = arith.constant dense<0.000000e+00> : vector<8x128xf32>
    %70 = tpu.matmul %69, %9, %cst_27 {dimension_numbers = #tpu.dot_dimension_numbers<[1], [0], [0], [1], [0, 0, 1, 1], [], []>} : vector<8x256xf32>, vector<256x128xf32>, vector<8x128xf32> -> vector<8x128xf32>
    %71 = vector.extract_strided_slice %70 {offsets = [0, 0], sizes = [8, 1], strides = [1, 1]} : vector<8x128xf32> to vector<8x1xf32>
    %cst_28 = arith.constant 3.906250e-03 : f32
    %72 = vector.broadcast %cst_28 : f32 to vector<8x1xf32>
    %73 = arith.mulf %68, %72 : vector<8x1xf32>
    %cst_29 = arith.constant 3.906250e-03 : f32
    %74 = vector.broadcast %cst_29 : f32 to vector<8x1xf32>
    %75 = arith.mulf %71, %74 : vector<8x1xf32>
    %76 = arith.mulf %73, %73 : vector<8x1xf32>
    %77 = arith.subf %75, %76 : vector<8x1xf32>
    %cst_30 = arith.constant 0.000000e+00 : f32
    %78 = vector.broadcast %cst_30 : f32 to vector<8x1xf32>
    %79 = arith.maximumf %77, %78 : vector<8x1xf32>
    %80 = vector.broadcast %73 : vector<8x1xf32> to vector<8x256xf32>
    %81 = arith.subf %64, %80 : vector<8x256xf32>
    %cst_31 = arith.constant 9.99999974E-6 : f32
    %82 = vector.broadcast %cst_31 : f32 to vector<8x1xf32>
    %83 = arith.addf %79, %82 : vector<8x1xf32>
    %84 = math.rsqrt %83 : vector<8x1xf32>
    %85 = vector.broadcast %84 : vector<8x1xf32> to vector<8x256xf32>
    %86 = arith.mulf %81, %85 : vector<8x256xf32>
    %87 = vector.broadcast %65 : vector<8x1xf32> to vector<8x256xf32>
    %88 = arith.mulf %86, %87 : vector<8x256xf32>
    %89 = vector.broadcast %66 : vector<8x1xf32> to vector<8x256xf32>
    %90 = arith.addf %88, %89 : vector<8x256xf32>
    %cst_32 = arith.constant dense<0.000000e+00> : vector<8x256xf32>
    %91 = tpu.matmul %2, %12, %cst_32 {dimension_numbers = #tpu.dot_dimension_numbers<[1], [0], [0], [1], [0, 0, 1, 1], [], []>} : vector<8x8xf32>, vector<8x256xf32>, vector<8x256xf32> -> vector<8x256xf32>
    %92 = vector.extract_strided_slice %3 {offsets = [0, 4], sizes = [8, 1], strides = [1, 1]} : vector<8x6xf32> to vector<8x1xf32>
    %93 = vector.extract_strided_slice %3 {offsets = [0, 5], sizes = [8, 1], strides = [1, 1]} : vector<8x6xf32> to vector<8x1xf32>
    %cst_33 = arith.constant dense<0.000000e+00> : vector<8x128xf32>
    %94 = tpu.matmul %91, %9, %cst_33 {dimension_numbers = #tpu.dot_dimension_numbers<[1], [0], [0], [1], [0, 0, 1, 1], [], []>} : vector<8x256xf32>, vector<256x128xf32>, vector<8x128xf32> -> vector<8x128xf32>
    %95 = vector.extract_strided_slice %94 {offsets = [0, 0], sizes = [8, 1], strides = [1, 1]} : vector<8x128xf32> to vector<8x1xf32>
    %96 = arith.mulf %91, %91 : vector<8x256xf32>
    %cst_34 = arith.constant dense<0.000000e+00> : vector<8x128xf32>
    %97 = tpu.matmul %96, %9, %cst_34 {dimension_numbers = #tpu.dot_dimension_numbers<[1], [0], [0], [1], [0, 0, 1, 1], [], []>} : vector<8x256xf32>, vector<256x128xf32>, vector<8x128xf32> -> vector<8x128xf32>
    %98 = vector.extract_strided_slice %97 {offsets = [0, 0], sizes = [8, 1], strides = [1, 1]} : vector<8x128xf32> to vector<8x1xf32>
    %cst_35 = arith.constant 3.906250e-03 : f32
    %99 = vector.broadcast %cst_35 : f32 to vector<8x1xf32>
    %100 = arith.mulf %95, %99 : vector<8x1xf32>
    %cst_36 = arith.constant 3.906250e-03 : f32
    %101 = vector.broadcast %cst_36 : f32 to vector<8x1xf32>
    %102 = arith.mulf %98, %101 : vector<8x1xf32>
    %103 = arith.mulf %100, %100 : vector<8x1xf32>
    %104 = arith.subf %102, %103 : vector<8x1xf32>
    %cst_37 = arith.constant 0.000000e+00 : f32
    %105 = vector.broadcast %cst_37 : f32 to vector<8x1xf32>
    %106 = arith.maximumf %104, %105 : vector<8x1xf32>
    %107 = vector.broadcast %100 : vector<8x1xf32> to vector<8x256xf32>
    %108 = arith.subf %91, %107 : vector<8x256xf32>
    %cst_38 = arith.constant 9.99999974E-6 : f32
    %109 = vector.broadcast %cst_38 : f32 to vector<8x1xf32>
    %110 = arith.addf %106, %109 : vector<8x1xf32>
    %111 = math.rsqrt %110 : vector<8x1xf32>
    %112 = vector.broadcast %111 : vector<8x1xf32> to vector<8x256xf32>
    %113 = arith.mulf %108, %112 : vector<8x256xf32>
    %114 = vector.broadcast %92 : vector<8x1xf32> to vector<8x256xf32>
    %115 = arith.mulf %113, %114 : vector<8x256xf32>
    %116 = vector.broadcast %93 : vector<8x1xf32> to vector<8x256xf32>
    %117 = arith.addf %115, %116 : vector<8x256xf32>
    %118 = arith.addf %90, %117 : vector<8x256xf32>
    %cst_39 = arith.constant 0.000000e+00 : f32
    %119 = vector.broadcast %cst_39 : f32 to vector<8x256xf32>
    %120 = arith.maximumf %118, %119 : vector<8x256xf32>
    %121 = arith.index_cast %c0_i32 : i32 to index
    %c0_40 = arith.constant 0 : index
    %c0_41 = arith.constant 0 : index
    %122 = vector.load %arg6[%121, %c0_40, %c0_41] : memref<2x8x256xf32, #tpu.memory_space<vmem>>, vector<1x8x256xf32>
    %123 = vector.shape_cast %122 : vector<1x8x256xf32> to vector<8x256xf32>
    %124 = vector.shape_cast %120 : vector<8x256xf32> to vector<1x8x256xf32>
    tpu.vector_store %arg6[%121, %c0_40, %c0_41], %124 {strides = array<i32>} : memref<2x8x256xf32, #tpu.memory_space<vmem>>, vector<1x8x256xf32>,
    %c1_i32 = arith.constant 1 : i32
    %125 = arith.index_cast %c1_i32 : i32 to index
    %c0_42 = arith.constant 0 : index
    %c0_43 = arith.constant 0 : index
    %126 = vector.load %arg1[%125, %c0_42, %c0_43] : memref<2x8x256xf32, #tpu.memory_space<vmem>>, vector<1x8x256xf32>
    %127 = vector.shape_cast %126 : vector<1x8x256xf32> to vector<8x256xf32>
    %c16_i32_44 = arith.constant 16 : i32
    %128 = tpu.dynamic_rotate %127 by %c16_i32_44 dim 1 : vector<8x256xf32>, i32 -> vector<8x256xf32>
    %cst_45 = arith.constant 0.000000e+00 : f32
    %129 = vector.shape_cast %6 : vector<1x256xi1> to vector<1x256xi1>
    %130 = vector.broadcast %129 : vector<1x256xi1> to vector<8x256xi1>
    %131 = vector.broadcast %cst_45 : f32 to vector<8x256xf32>
    %132 = arith.select %130, %128, %131 : vector<8x256xi1>, vector<8x256xf32>
    %c240_i32_46 = arith.constant 240 : i32
    %133 = tpu.dynamic_rotate %127 by %c240_i32_46 dim 1 : vector<8x256xf32>, i32 -> vector<8x256xf32>
    %cst_47 = arith.constant 0.000000e+00 : f32
    %134 = vector.shape_cast %8 : vector<1x256xi1> to vector<1x256xi1>
    %135 = vector.broadcast %134 : vector<1x256xi1> to vector<8x256xi1>
    %136 = vector.broadcast %cst_47 : f32 to vector<8x256xf32>
    %137 = arith.select %135, %133, %136 : vector<8x256xi1>, vector<8x256xf32>
    %138 = tpu.concatenate %132, %127, %137 in 0 : vector<8x256xf32>, vector<8x256xf32>, vector<8x256xf32> -> vector<24x256xf32>
    %cst_48 = arith.constant dense<0.000000e+00> : vector<8x256xf32>
    %139 = tpu.matmul %0, %138, %cst_48 {dimension_numbers = #tpu.dot_dimension_numbers<[1], [0], [0], [1], [0, 0, 1, 1], [], []>} : vector<8x24xf32>, vector<24x256xf32>, vector<8x256xf32> -> vector<8x256xf32>
    %140 = vector.extract_strided_slice %3 {offsets = [0, 0], sizes = [8, 1], strides = [1, 1]} : vector<8x6xf32> to vector<8x1xf32>
    %141 = vector.extract_strided_slice %3 {offsets = [0, 1], sizes = [8, 1], strides = [1, 1]} : vector<8x6xf32> to vector<8x1xf32>
    %cst_49 = arith.constant dense<0.000000e+00> : vector<8x128xf32>
    %142 = tpu.matmul %139, %9, %cst_49 {dimension_numbers = #tpu.dot_dimension_numbers<[1], [0], [0], [1], [0, 0, 1, 1], [], []>} : vector<8x256xf32>, vector<256x128xf32>, vector<8x128xf32> -> vector<8x128xf32>
    %143 = vector.extract_strided_slice %142 {offsets = [0, 0], sizes = [8, 1], strides = [1, 1]} : vector<8x128xf32> to vector<8x1xf32>
    %144 = arith.mulf %139, %139 : vector<8x256xf32>
    %cst_50 = arith.constant dense<0.000000e+00> : vector<8x128xf32>
    %145 = tpu.matmul %144, %9, %cst_50 {dimension_numbers = #tpu.dot_dimension_numbers<[1], [0], [0], [1], [0, 0, 1, 1], [], []>} : vector<8x256xf32>, vector<256x128xf32>, vector<8x128xf32> -> vector<8x128xf32>
    %146 = vector.extract_strided_slice %145 {offsets = [0, 0], sizes = [8, 1], strides = [1, 1]} : vector<8x128xf32> to vector<8x1xf32>
    %cst_51 = arith.constant 3.906250e-03 : f32
    %147 = vector.broadcast %cst_51 : f32 to vector<8x1xf32>
    %148 = arith.mulf %143, %147 : vector<8x1xf32>
    %cst_52 = arith.constant 3.906250e-03 : f32
    %149 = vector.broadcast %cst_52 : f32 to vector<8x1xf32>
    %150 = arith.mulf %146, %149 : vector<8x1xf32>
    %151 = arith.mulf %148, %148 : vector<8x1xf32>
    %152 = arith.subf %150, %151 : vector<8x1xf32>
    %cst_53 = arith.constant 0.000000e+00 : f32
    %153 = vector.broadcast %cst_53 : f32 to vector<8x1xf32>
    %154 = arith.maximumf %152, %153 : vector<8x1xf32>
    %155 = vector.broadcast %148 : vector<8x1xf32> to vector<8x256xf32>
    %156 = arith.subf %139, %155 : vector<8x256xf32>
    %cst_54 = arith.constant 9.99999974E-6 : f32
    %157 = vector.broadcast %cst_54 : f32 to vector<8x1xf32>
    %158 = arith.addf %154, %157 : vector<8x1xf32>
    %159 = math.rsqrt %158 : vector<8x1xf32>
    %160 = vector.broadcast %159 : vector<8x1xf32> to vector<8x256xf32>
    %161 = arith.mulf %156, %160 : vector<8x256xf32>
    %162 = vector.broadcast %140 : vector<8x1xf32> to vector<8x256xf32>
    %163 = arith.mulf %161, %162 : vector<8x256xf32>
    %164 = vector.broadcast %141 : vector<8x1xf32> to vector<8x256xf32>
    %165 = arith.addf %163, %164 : vector<8x256xf32>
    %cst_55 = arith.constant 0.000000e+00 : f32
    %166 = vector.broadcast %cst_55 : f32 to vector<8x256xf32>
    %167 = arith.maximumf %165, %166 : vector<8x256xf32>
    %c16_i32_56 = arith.constant 16 : i32
    %168 = tpu.dynamic_rotate %167 by %c16_i32_56 dim 1 : vector<8x256xf32>, i32 -> vector<8x256xf32>
    %cst_57 = arith.constant 0.000000e+00 : f32
    %169 = vector.shape_cast %6 : vector<1x256xi1> to vector<1x256xi1>
    %170 = vector.broadcast %169 : vector<1x256xi1> to vector<8x256xi1>
    %171 = vector.broadcast %cst_57 : f32 to vector<8x256xf32>
    %172 = arith.select %170, %168, %171 : vector<8x256xi1>, vector<8x256xf32>
    %c240_i32_58 = arith.constant 240 : i32
    %173 = tpu.dynamic_rotate %167 by %c240_i32_58 dim 1 : vector<8x256xf32>, i32 -> vector<8x256xf32>
    %cst_59 = arith.constant 0.000000e+00 : f32
    %174 = vector.shape_cast %8 : vector<1x256xi1> to vector<1x256xi1>
    %175 = vector.broadcast %174 : vector<1x256xi1> to vector<8x256xi1>
    %176 = vector.broadcast %cst_59 : f32 to vector<8x256xf32>
    %177 = arith.select %175, %173, %176 : vector<8x256xi1>, vector<8x256xf32>
    %178 = tpu.concatenate %172, %167, %177 in 0 : vector<8x256xf32>, vector<8x256xf32>, vector<8x256xf32> -> vector<24x256xf32>
    %cst_60 = arith.constant dense<0.000000e+00> : vector<8x256xf32>
    %179 = tpu.matmul %1, %178, %cst_60 {dimension_numbers = #tpu.dot_dimension_numbers<[1], [0], [0], [1], [0, 0, 1, 1], [], []>} : vector<8x24xf32>, vector<24x256xf32>, vector<8x256xf32> -> vector<8x256xf32>
    %180 = vector.extract_strided_slice %3 {offsets = [0, 2], sizes = [8, 1], strides = [1, 1]} : vector<8x6xf32> to vector<8x1xf32>
    %181 = vector.extract_strided_slice %3 {offsets = [0, 3], sizes = [8, 1], strides = [1, 1]} : vector<8x6xf32> to vector<8x1xf32>
    %cst_61 = arith.constant dense<0.000000e+00> : vector<8x128xf32>
    %182 = tpu.matmul %179, %9, %cst_61 {dimension_numbers = #tpu.dot_dimension_numbers<[1], [0], [0], [1], [0, 0, 1, 1], [], []>} : vector<8x256xf32>, vector<256x128xf32>, vector<8x128xf32> -> vector<8x128xf32>
    %183 = vector.extract_strided_slice %182 {offsets = [0, 0], sizes = [8, 1], strides = [1, 1]} : vector<8x128xf32> to vector<8x1xf32>
    %184 = arith.mulf %179, %179 : vector<8x256xf32>
    %cst_62 = arith.constant dense<0.000000e+00> : vector<8x128xf32>
    %185 = tpu.matmul %184, %9, %cst_62 {dimension_numbers = #tpu.dot_dimension_numbers<[1], [0], [0], [1], [0, 0, 1, 1], [], []>} : vector<8x256xf32>, vector<256x128xf32>, vector<8x128xf32> -> vector<8x128xf32>
    %186 = vector.extract_strided_slice %185 {offsets = [0, 0], sizes = [8, 1], strides = [1, 1]} : vector<8x128xf32> to vector<8x1xf32>
    %cst_63 = arith.constant 3.906250e-03 : f32
    %187 = vector.broadcast %cst_63 : f32 to vector<8x1xf32>
    %188 = arith.mulf %183, %187 : vector<8x1xf32>
    %cst_64 = arith.constant 3.906250e-03 : f32
    %189 = vector.broadcast %cst_64 : f32 to vector<8x1xf32>
    %190 = arith.mulf %186, %189 : vector<8x1xf32>
    %191 = arith.mulf %188, %188 : vector<8x1xf32>
    %192 = arith.subf %190, %191 : vector<8x1xf32>
    %cst_65 = arith.constant 0.000000e+00 : f32
    %193 = vector.broadcast %cst_65 : f32 to vector<8x1xf32>
    %194 = arith.maximumf %192, %193 : vector<8x1xf32>
    %195 = vector.broadcast %188 : vector<8x1xf32> to vector<8x256xf32>
    %196 = arith.subf %179, %195 : vector<8x256xf32>
    %cst_66 = arith.constant 9.99999974E-6 : f32
    %197 = vector.broadcast %cst_66 : f32 to vector<8x1xf32>
    %198 = arith.addf %194, %197 : vector<8x1xf32>
    %199 = math.rsqrt %198 : vector<8x1xf32>
    %200 = vector.broadcast %199 : vector<8x1xf32> to vector<8x256xf32>
    %201 = arith.mulf %196, %200 : vector<8x256xf32>
    %202 = vector.broadcast %180 : vector<8x1xf32> to vector<8x256xf32>
    %203 = arith.mulf %201, %202 : vector<8x256xf32>
    %204 = vector.broadcast %181 : vector<8x1xf32> to vector<8x256xf32>
    %205 = arith.addf %203, %204 : vector<8x256xf32>
    %cst_67 = arith.constant dense<0.000000e+00> : vector<8x256xf32>
    %206 = tpu.matmul %2, %127, %cst_67 {dimension_numbers = #tpu.dot_dimension_numbers<[1], [0], [0], [1], [0, 0, 1, 1], [], []>} : vector<8x8xf32>, vector<8x256xf32>, vector<8x256xf32> -> vector<8x256xf32>
    %207 = vector.extract_strided_slice %3 {offsets = [0, 4], sizes = [8, 1], strides = [1, 1]} : vector<8x6xf32> to vector<8x1xf32>
    %208 = vector.extract_strided_slice %3 {offsets = [0, 5], sizes = [8, 1], strides = [1, 1]} : vector<8x6xf32> to vector<8x1xf32>
    %cst_68 = arith.constant dense<0.000000e+00> : vector<8x128xf32>
    %209 = tpu.matmul %206, %9, %cst_68 {dimension_numbers = #tpu.dot_dimension_numbers<[1], [0], [0], [1], [0, 0, 1, 1], [], []>} : vector<8x256xf32>, vector<256x128xf32>, vector<8x128xf32> -> vector<8x128xf32>
    %210 = vector.extract_strided_slice %209 {offsets = [0, 0], sizes = [8, 1], strides = [1, 1]} : vector<8x128xf32> to vector<8x1xf32>
    %211 = arith.mulf %206, %206 : vector<8x256xf32>
    %cst_69 = arith.constant dense<0.000000e+00> : vector<8x128xf32>
    %212 = tpu.matmul %211, %9, %cst_69 {dimension_numbers = #tpu.dot_dimension_numbers<[1], [0], [0], [1], [0, 0, 1, 1], [], []>} : vector<8x256xf32>, vector<256x128xf32>, vector<8x128xf32> -> vector<8x128xf32>
    %213 = vector.extract_strided_slice %212 {offsets = [0, 0], sizes = [8, 1], strides = [1, 1]} : vector<8x128xf32> to vector<8x1xf32>
    %cst_70 = arith.constant 3.906250e-03 : f32
    %214 = vector.broadcast %cst_70 : f32 to vector<8x1xf32>
    %215 = arith.mulf %210, %214 : vector<8x1xf32>
    %cst_71 = arith.constant 3.906250e-03 : f32
    %216 = vector.broadcast %cst_71 : f32 to vector<8x1xf32>
    %217 = arith.mulf %213, %216 : vector<8x1xf32>
    %218 = arith.mulf %215, %215 : vector<8x1xf32>
    %219 = arith.subf %217, %218 : vector<8x1xf32>
    %cst_72 = arith.constant 0.000000e+00 : f32
    %220 = vector.broadcast %cst_72 : f32 to vector<8x1xf32>
    %221 = arith.maximumf %219, %220 : vector<8x1xf32>
    %222 = vector.broadcast %215 : vector<8x1xf32> to vector<8x256xf32>
    %223 = arith.subf %206, %222 : vector<8x256xf32>
    %cst_73 = arith.constant 9.99999974E-6 : f32
    %224 = vector.broadcast %cst_73 : f32 to vector<8x1xf32>
    %225 = arith.addf %221, %224 : vector<8x1xf32>
    %226 = math.rsqrt %225 : vector<8x1xf32>
    %227 = vector.broadcast %226 : vector<8x1xf32> to vector<8x256xf32>
    %228 = arith.mulf %223, %227 : vector<8x256xf32>
    %229 = vector.broadcast %207 : vector<8x1xf32> to vector<8x256xf32>
    %230 = arith.mulf %228, %229 : vector<8x256xf32>
    %231 = vector.broadcast %208 : vector<8x1xf32> to vector<8x256xf32>
    %232 = arith.addf %230, %231 : vector<8x256xf32>
    %233 = arith.addf %205, %232 : vector<8x256xf32>
    %cst_74 = arith.constant 0.000000e+00 : f32
    %234 = vector.broadcast %cst_74 : f32 to vector<8x256xf32>
    %235 = arith.maximumf %233, %234 : vector<8x256xf32>
    %236 = arith.index_cast %c1_i32 : i32 to index
    %c0_75 = arith.constant 0 : index
    %c0_76 = arith.constant 0 : index
    %237 = vector.load %arg6[%236, %c0_75, %c0_76] : memref<2x8x256xf32, #tpu.memory_space<vmem>>, vector<1x8x256xf32>
    %238 = vector.shape_cast %237 : vector<1x8x256xf32> to vector<8x256xf32>
    %239 = vector.shape_cast %235 : vector<8x256xf32> to vector<1x8x256xf32>
    tpu.vector_store %arg6[%236, %c0_75, %c0_76], %239 {strides = array<i32>} : memref<2x8x256xf32, #tpu.memory_space<vmem>>, vector<1x8x256xf32>,
    %c2_i32 = arith.constant 2 : i32
    return
  }
  func.func @transform_0(%arg0: i32) -> (i32, i32, i32) {
    %c0_i32 = arith.constant 0 : i32
    %c0_i32_0 = arith.constant 0 : i32
    %c0_i32_1 = arith.constant 0 : i32
    return %arg0, %c0_i32, %c0_i32_0 : i32, i32, i32
  }
  func.func @transform_1(%arg0: i32) -> (i32, i32) {
    %c0_i32 = arith.constant 0 : i32
    %c0_i32_0 = arith.constant 0 : i32
    %c0_i32_1 = arith.constant 0 : i32
    return %c0_i32, %c0_i32_0 : i32, i32
  }
  func.func @transform_2(%arg0: i32) -> (i32, i32) {
    %c0_i32 = arith.constant 0 : i32
    %c0_i32_0 = arith.constant 0 : i32
    %c0_i32_1 = arith.constant 0 : i32
    return %c0_i32, %c0_i32_0 : i32, i32
  }
  func.func @transform_3(%arg0: i32) -> (i32, i32) {
    %c0_i32 = arith.constant 0 : i32
    %c0_i32_0 = arith.constant 0 : i32
    %c0_i32_1 = arith.constant 0 : i32
    return %c0_i32, %c0_i32_0 : i32, i32
  }
  func.func @transform_4(%arg0: i32) -> (i32, i32) {
    %c0_i32 = arith.constant 0 : i32
    %c0_i32_0 = arith.constant 0 : i32
    %c0_i32_1 = arith.constant 0 : i32
    return %c0_i32, %c0_i32_0 : i32, i32
  }
  func.func @transform_5(%arg0: i32) -> (i32, i32, i32) {
    %c0_i32 = arith.constant 0 : i32
    %c0_i32_0 = arith.constant 0 : i32
    %c0_i32_1 = arith.constant 0 : i32
    return %arg0, %c0_i32, %c0_i32_0 : i32, i32, i32
  }
}

</mosaic_0001>

<bundles_post_ra>
// kernel: tpu_custom_call.1
= control target key start
LH: loop header
LB: loop body
LE: loop exit
PB: predicated region body
PF: predicated region fallthrough
CT: control target
= control target key end

     0   :  { %10 = vsyncpa [#allocation3], 0  ;;  %s2064_s0 = inlined_call_operand.hbm [shape: f32[2,8,256], index: 0, kind: input, shape index: {}]   ;;  %s2065_s1 = inlined_call_operand.hbm [shape: f32[8,24], index: 1, kind: input, shape index: {}]   ;;  %s2066_s2 = inlined_call_operand.hbm [shape: f32[8,24], index: 2, kind: input, shape index: {}]   ;;  %s2067_s3 = inlined_call_operand.hbm [shape: f32[8,8], index: 3, kind: input, shape index: {}]   ;;  %s2068_s4 = inlined_call_operand.hbm [shape: f32[8,6], index: 4, kind: input, shape index: {}]   ;;  %s2069_s5 = inlined_call_operand.hbm [shape: f32[2,8,256], index: 5, kind: output, shape index: {}]  }
   0x1   :  { %11 = vsyncpa [#allocation6], 0 }
   0x2   :  { %12 = vsyncpa [#allocation9], 0  ;;  %s32_s20 = sshll.u32 %s2065_s1, 4  ;;  %s33_s20 = int_to_ptr.hbm [resolvable:$true] %s32_s20 }
   0x3   :  { %13 = vsyncpa [#allocation4], 0  ;;  %s1402_s21 = smov [#allocation5]   ;;  %s54_s25 = sshll.u32 %s2067_s3, 4  ;;  %s55_s25 = int_to_ptr.hbm [resolvable:$true] %s54_s25 }
   0x4   :  { %s34_s22 = sshll.u32 %s1402_s21, 4  ;;  %s1403_s26 = smov [#allocation8]   ;;  %s35_s22 = int_to_ptr.vmem [resolvable:$true] %s34_s22 }
   0x5   :  { %37 = dma.hbm_to_vmem [thread:$0]  %s33_s20, 128, %s35_s22, [#allocation6]  }
   0x6   :  { %s56_s27 = sshll.u32 %s1403_s26, 4  ;;  %s18_s30 = sshll.u32 %s2064_s0, 4  ;;  %s57_s27 = int_to_ptr.vmem [resolvable:$true] %s56_s27  ;;  %s19_s30 = int_to_ptr.hbm [resolvable:$true] %s18_s30 }
   0x7   :  { %59 = dma.hbm_to_vmem [thread:$0]  %s55_s25, 128, %s57_s27, [#allocation9]  }
   0x8   :  { %s1404_s1 = smov [#allocation2]   ;;  %s43_s9 = sshll.u32 %s2066_s2, 4  ;;  %s44_s9 = int_to_ptr.hbm [resolvable:$true] %s43_s9 }
   0x9   :  { %s20_s6 = sshll.u32 %s1404_s1, 4  ;;  %s1405_s10 = smov 256   ;;  %s21_s6 = int_to_ptr.vmem [resolvable:$true] %s20_s6 }
   0xa   :  { %s1406_s3 = smov 16   ;;  %s1407_s11 = smov [#allocation7]  }
   0xb   :  { %26 = dma.hbm_to_vmem [thread:$0]  %s19_s30, 512, %s21_s6, [#allocation3], %s1405_s10, %s1405_s10, %s1406_s3  }
   0xc   :  { %s45_s12 = sshll.u32 %s1407_s11, 4  ;;  %s65_s14 = sshll.u32 %s2068_s4, 4  ;;  %s46_s12 = int_to_ptr.vmem [resolvable:$true] %s45_s12  ;;  %s66_s14 = int_to_ptr.hbm [resolvable:$true] %s65_s14 }
   0xd   :  { %48 = dma.hbm_to_vmem [thread:$0]  %s44_s9, 128, %s46_s12, [#allocation6]  }
   0xe   :  { %s1408_s15 = smov [#allocation10]  }
   0xf   :  { %s67_s16 = sshll.u32 %s1408_s15, 4  ;;  %s68_s16 = int_to_ptr.vmem [resolvable:$true] %s67_s16 }
  0x10   :  { %70 = dma.hbm_to_vmem [thread:$0]  %s66_s14, 128, %s68_s16, [#allocation9]  }
  0x11   :  { %1394 = dma.done.wait [#allocation3], 512  }
  0x12   :  { %1395 = vsyncadd [#allocation3], 4294966784 }
  0x13   :  { %1396 = dma.done.wait [#allocation6], 256  }
  0x14   :  { %1397 = vsyncadd [#allocation6], 4294967040 }
  0x15   :  { %1398 = dma.done.wait [#allocation9], 256  }
  0x16   :  { %1399 = vsyncadd [#allocation9], 4294967040  ;;  %v1466_v0 = vld [vmem:[#allocation2] sm:$0xff]  ;;  %s1409_s2 = smov 112   ;;  %v1472_v1 = vld [vmem:[#allocation2 + $0x8] sm:$0xff]  ;;  %v1410_v2 = vmov 1.0   ;;  %v95_v3 = vlaneseq }
  0x17   :  { %104 = vrot.lane.b32.xlu1 %v1466_v0, %s1406_s3  ;;  %117 = vrot.lane.b32.xlu0 %v1466_v0, %s1409_s2  ;;  %v1523_v12 = vld [vmem:[#allocation5] sm:$0xff]  ;;  %vm130_vm4 = vcmask 195584   ;;  %v1411_v19 = vmov 0   ;;  %v1607_v20 = vld [vmem:[#allocation10] sm:$0xff]  ;;  %v1412_v21 = vmov 1   ;;  %v1629_v61 = vld [vmem:[#allocation7] sm:$0xff] }
  0x18   :  { %174 = vmatpush.msra.mxu2 %v1410_v2  ;;  %194 = vmatpush.msra.mxu3 %v1410_v2  ;;  %v1494_v4 = vand.u32 127, %v95_v3  ;;  %vm484_vm8 = vcmask 64512   ;;  %s1417_s4 = smov [#allocation11]   ;;  %s1176_s20 = sshll.u32 %s2069_s5, 4  ;;  %s1177_s20 = int_to_ptr.hbm [resolvable:$true] %s1176_s20 }
  0x19   :  { %1227 = vset.pattern.permute.xlu2 %v1411_v19  ;;  %1228 = vset.pattern.permute.xlu0 %v1411_v19  ;;  %s1174_s17 = sshll.u32 %s1417_s4, 4  ;;  %s1175_s17 = int_to_ptr.vmem [resolvable:$true] %s1174_s17 }
  0x1a   :  { %175 = vmatpush.msra.mxu2 %v1410_v2  ;;  %195 = vmatpush.msra.mxu3 %v1410_v2  ;;  %v1501_v7 = vadd.s32 128, %v1494_v4  ;;  %vm121_vm0 = vcmp.lt.s32.totalorder %v1494_v4, 112  ;;  %vm108_vm2 = vcmp.lt.s32.totalorder %v1494_v4, 16  ;;  %vm98_vm3 = vcmp.ge.s32.totalorder %v1494_v4, 16 }
  0x1b   :  { %1229 = vset.pattern.permute.xlu1 %v1412_v21 }
  0x1c   :  { %176 = vmatpush.msra.mxu2 %v1410_v2  ;;  %196 = vmatpush.msra.mxu3 %v1410_v2  ;;  %vm101_vm1 = vcmp.lt.s32.totalorder %v1501_v7, 240 }
  0x1e   :  { %177 = vmatpush.msra.mxu2 %v1410_v2  ;;  %197 = vmatpush.msra.mxu3 %v1410_v2 }
  0x1f   :  { %106 = vrot.lane.b32.xlu1 %v1472_v1, %s1406_s3  ;;  %119 = vrot.lane.b32.xlu0 %v1472_v1, %s1409_s2 }
  0x20   :  { %178 = vmatpush.msra.mxu2 %v1410_v2  ;;  %198 = vmatpush.msra.mxu3 %v1410_v2 }
  0x22   :  { %179 = vmatpush.msra.mxu2 %v1410_v2  ;;  %199 = vmatpush.msra.mxu3 %v1410_v2 }
  0x24   :  { %180 = vmatpush.msra.mxu2 %v1410_v2  ;;  %200 = vmatpush.msra.mxu3 %v1410_v2 }
  0x26   :  { %181 = vmatpush.msra.mxu2 %v1410_v2  ;;  %201 = vmatpush.msra.mxu3 %v1410_v2 }
  0x27   :  { %288 = vperm.xlu0 %1228, %v1607_v20   ;;  %294 = vperm.xlu1 %1229, %v1607_v20  }
  0x28   :  { %182 = vmatpush.msra.mxu2 %v1410_v2  ;;  %202 = vmatpush.msra.mxu3 %v1410_v2 }
  0x2a   :  { %183 = vmatpush.msra.mxu2 %v1410_v2  ;;  %203 = vmatpush.msra.mxu3 %v1410_v2 }
  0x2c   :  { %184 = vmatpush.msra.mxu2 %v1410_v2  ;;  %204 = vmatpush.msra.mxu3 %v1410_v2 }
  0x2e   :  { %185 = vmatpush.msra.mxu2 %v1410_v2  ;;  %205 = vmatpush.msra.mxu3 %v1410_v2 }
  0x30   :  { %186 = vmatpush.msra.mxu2 %v1410_v2  ;;  %206 = vmatpush.msra.mxu3 %v1410_v2 }
  0x32   :  { %187 = vmatpush.msra.mxu2 %v1410_v2  ;;  %207 = vmatpush.msra.mxu3 %v1410_v2 }
  0x34   :  { %188 = vmatpush.msra.mxu2 %v1410_v2  ;;  %208 = vmatpush.msra.mxu3 %v1410_v2 }
  0x36   :  { %189 = vmatpush.msra.mxu2 %v1410_v2  ;;  %209 = vmatpush.msra.mxu3 %v1410_v2 }
  0x89   :  { %v105_v5 = vpop.permute.xlu1 %104  ;;  %v118_v6 = vpop.permute.xlu0 %117 }
  0x91   :  { %v120_v8 = vpop.permute.xlu0 %119  ;;  %v107_v11 = vpop.permute.xlu1 %106 }
  0x92   :  { %v122_v9 = vsel %vm121_vm0, %v118_v6, %v120_v8  ;;  %v123_v10 = vsel %vm121_vm0, %v120_v8, %v118_v6  ;;  %v110_v13 = vsel %vm108_vm2, %v107_v11, %v105_v5  ;;  %v109_v14 = vsel %vm108_vm2, %v105_v5, %v107_v11 }
  0x93   :  { %147 = vmatpush.msra.mxu0 %v122_v9  ;;  %1193 = vmatpush.msk.msra.mxu1 %vm101_vm1, %v123_v10  ;;  %v1731_v9 = vld [vmem:[#allocation8] sm:$0xff] }
  0x95   :  { %148 = vmatpush.msra.mxu0 %v1466_v0  ;;  %168 = vmatpush.msra.mxu1 %v1472_v1 }
  0x97   :  { %1191 = vmatpush.msk.msra.mxu0 %vm98_vm3, %v110_v13  ;;  %169 = vmatpush.msra.mxu1 %v109_v14 }
  0x98   :  { %1192 = vmatmul.msk.f32.vlgmr.msra.gmra.mxu0 %vm130_vm4, %v1523_v12  ;;  %1194 = vmatmul.msk.f32.vlgmr.msra.gmra.mxu1 %vm130_vm4, %v1523_v12 }
  0x99   :  { %216 = vmatpush.msrb.mxu0 %v1410_v2  ;;  %236 = vmatpush.msrb.mxu1 %v1410_v2  ;;  %v1611_v45 = vpop.permute.xlu0 %288  ;;  %v1613_v48 = vpop.permute.xlu1 %294 }
  0x9b   :  { %217 = vmatpush.msrb.mxu0 %v1410_v2  ;;  %237 = vmatpush.msrb.mxu1 %v1410_v2 }
  0x9d   :  { %218 = vmatpush.msrb.mxu0 %v1410_v2  ;;  %238 = vmatpush.msrb.mxu1 %v1410_v2 }
  0x9f   :  { %219 = vmatpush.msrb.mxu0 %v1410_v2  ;;  %239 = vmatpush.msrb.mxu1 %v1410_v2 }
  0xa1   :  { %220 = vmatpush.msrb.mxu0 %v1410_v2  ;;  %240 = vmatpush.msrb.mxu1 %v1410_v2 }
  0xa3   :  { %221 = vmatpush.msrb.mxu0 %v1410_v2  ;;  %241 = vmatpush.msrb.mxu1 %v1410_v2 }
  0xa5   :  { %222 = vmatpush.msrb.mxu0 %v1410_v2  ;;  %242 = vmatpush.msrb.mxu1 %v1410_v2 }
  0xa7   :  { %223 = vmatpush.msrb.mxu0 %v1410_v2  ;;  %243 = vmatpush.msrb.mxu1 %v1410_v2 }
  0xa9   :  { %224 = vmatpush.msrb.mxu0 %v1410_v2  ;;  %244 = vmatpush.msrb.mxu1 %v1410_v2 }
  0xab   :  { %225 = vmatpush.msrb.mxu0 %v1410_v2  ;;  %245 = vmatpush.msrb.mxu1 %v1410_v2 }
  0xad   :  { %226 = vmatpush.msrb.mxu0 %v1410_v2  ;;  %246 = vmatpush.msrb.mxu1 %v1410_v2 }
  0xaf   :  { %227 = vmatpush.msrb.mxu0 %v1410_v2  ;;  %247 = vmatpush.msrb.mxu1 %v1410_v2 }
  0xb1   :  { %228 = vmatpush.msrb.mxu0 %v1410_v2  ;;  %248 = vmatpush.msrb.mxu1 %v1410_v2 }
  0xb3   :  { %229 = vmatpush.msrb.mxu0 %v1410_v2  ;;  %249 = vmatpush.msrb.mxu1 %v1410_v2 }
  0xb5   :  { %230 = vmatpush.msrb.mxu0 %v1410_v2  ;;  %250 = vmatpush.msrb.mxu1 %v1410_v2 }
  0xb7   :  { %231 = vmatpush.msrb.mxu0 %v1410_v2  ;;  %251 = vmatpush.msrb.mxu1 %v1410_v2 }
  0xb9   :  { %360 = vmatpush.msra.mxu0 %v1410_v2  ;;  %380 = vmatpush.msra.mxu1 %v1410_v2 }
  0xbb   :  { %361 = vmatpush.msra.mxu0 %v1410_v2  ;;  %381 = vmatpush.msra.mxu1 %v1410_v2 }
  0xbd   :  { %362 = vmatpush.msra.mxu0 %v1410_v2  ;;  %382 = vmatpush.msra.mxu1 %v1410_v2 }
  0xbf   :  { %363 = vmatpush.msra.mxu0 %v1410_v2  ;;  %383 = vmatpush.msra.mxu1 %v1410_v2 }
  0xc1   :  { %364 = vmatpush.msra.mxu0 %v1410_v2  ;;  %384 = vmatpush.msra.mxu1 %v1410_v2 }
  0xc3   :  { %365 = vmatpush.msra.mxu0 %v1410_v2  ;;  %385 = vmatpush.msra.mxu1 %v1410_v2 }
  0xc5   :  { %366 = vmatpush.msra.mxu0 %v1410_v2  ;;  %386 = vmatpush.msra.mxu1 %v1410_v2 }
  0xc7   :  { %367 = vmatpush.msra.mxu0 %v1410_v2  ;;  %387 = vmatpush.msra.mxu1 %v1410_v2 }
  0xc9   :  { %368 = vmatpush.msra.mxu0 %v1410_v2  ;;  %388 = vmatpush.msra.mxu1 %v1410_v2 }
  0xcb   :  { %369 = vmatpush.msra.mxu0 %v1410_v2  ;;  %389 = vmatpush.msra.mxu1 %v1410_v2 }
  0xcd   :  { %370 = vmatpush.msra.mxu0 %v1410_v2  ;;  %390 = vmatpush.msra.mxu1 %v1410_v2 }
  0xcf   :  { %371 = vmatpush.msra.mxu0 %v1410_v2  ;;  %391 = vmatpush.msra.mxu1 %v1410_v2 }
  0xd1   :  { %372 = vmatpush.msra.mxu0 %v1410_v2  ;;  %392 = vmatpush.msra.mxu1 %v1410_v2 }
  0xd3   :  { %373 = vmatpush.msra.mxu0 %v1410_v2  ;;  %393 = vmatpush.msra.mxu1 %v1410_v2 }
  0xd5   :  { %374 = vmatpush.msra.mxu0 %v1410_v2  ;;  %394 = vmatpush.msra.mxu1 %v1410_v2 }
  0xd7   :  { %375 = vmatpush.msra.mxu0 %v1410_v2  ;;  %395 = vmatpush.msra.mxu1 %v1410_v2 }
 0x115   :  { %v151_v15 = vpop.f32.mrf.mxu0  ;;  %v171_v16 = vpop.f32.mrf.mxu1 }
 0x116   :  { %v214_v17 = vmul.f32 %v151_v15, %v151_v15  ;;  %v215_v18 = vmul.f32 %v171_v16, %v171_v16  ;;  %190 = vmatmul.f32.vlgmr.msra.gmra.mxu2 %v151_v15  ;;  %210 = vmatmul.f32.vlgmr.msra.gmra.mxu3 %v171_v16 }
 0x118   :  { %232 = vmatmul.f32.vlgmr.msrb.gmra.mxu0 %v214_v17  ;;  %252 = vmatmul.f32.vlgmr.msrb.gmra.mxu1 %v215_v18 }
 0x119   :  { %503 = vmatpush.msrb.mxu0 %v1466_v0  ;;  %523 = vmatpush.msrb.mxu1 %v1472_v1  ;;  %v1705_v0 = vld [vmem:[#allocation2 + $0x10] sm:$0xff]  ;;  %v1711_v1 = vld [vmem:[#allocation2 + $0x18] sm:$0xff] }
 0x195   :  { %v233_v22 = vpop.f32.mrf.mxu0  ;;  %v253_v23 = vpop.f32.mrf.mxu1 }
 0x196   :  { %v254_v26 = vadd.f32 %v253_v23, %v233_v22 }
 0x198   :  { %v257_v29 = vmul.f32 0.00390625, %v254_v26 }
 0x199   :  { %v191_v24 = vpop.f32.mrf.mxu2  ;;  %v211_v25 = vpop.f32.mrf.mxu3 }
 0x19a   :  { %v212_v27 = vadd.f32 %v211_v25, %v191_v24 }
 0x19c   :  { %v256_v28 = vmul.f32 0.00390625, %v212_v27 }
 0x19e   :  { %v258_v30 = vmul.f32 %v256_v28, %v256_v28  ;;  %263 = vperm.xlu2 %1227, %v256_v28  }
 0x1a0   :  { %v259_v31 = vsub.f32 %v257_v29, %v258_v30 }
 0x1a2   :  { %v260_v32 = vmax.f32 %v259_v31, 0.0 }
 0x1a4   :  { %v268_v33 = vadd.f32 1e-05, %v260_v32 }
 0x1a6   :  { %1237 = vrsqrt.f32 %v268_v33  ;;  %vm275_vm6 = vweird.f32 %v268_v33 }
 0x1ac   :  { %v1238_v34 = vpop.eup %1237 }
 0x1ad   :  { %v270_v35 = vmul.f32 %v1238_v34, %v268_v33  ;;  %vm276_vm5 = vweird.f32 %v1238_v34 }
 0x1ae   :  { %vm277_vm7 = vmor %vm275_vm6, %vm276_vm5 }
 0x1af   :  { %v271_v36 = vmul.f32 %v1238_v34, %v270_v35 }
 0x1b1   :  { %v272_v37 = vmul.f32 0.5, %v271_v36 }
 0x1b3   :  { %v273_v38 = vsub.f32 1.5, %v272_v37 }
 0x1b5   :  { %v274_v39 = vmul.f32 %v1238_v34, %v273_v38 }
 0x1b7   :  { %v278_v40 = vsel %vm277_vm7, %v1238_v34, %v274_v39 }
 0x1b8   :  { %281 = vperm.xlu2 %1227, %v278_v40  }
 0x1f8   :  { %v264_v41 = vpop.permute.xlu2 %263 }
 0x1f9   :  { %v266_v42 = vsub.f32 %v151_v15, %v264_v41  ;;  %v267_v43 = vsub.f32 %v171_v16, %v264_v41 }
 0x212   :  { %v282_v44 = vpop.permute.xlu2 %281 }
 0x213   :  { %v284_v46 = vmul.f32 %v282_v44, %v266_v42  ;;  %v285_v47 = vmul.f32 %v282_v44, %v267_v43 }
 0x215   :  { %v291_v49 = vmul.f32 %v1611_v45, %v284_v46  ;;  %v292_v50 = vmul.f32 %v1611_v45, %v285_v47 }
 0x217   :  { %v298_v51 = vadd.f32 %v1613_v48, %v292_v50  ;;  %v297_v52 = vadd.f32 %v1613_v48, %v291_v49 }
 0x219   :  { %v300_v53 = vmax.f32 %v298_v51, 0.0  ;;  %v299_v54 = vmax.f32 %v297_v52, 0.0 }
 0x21b   :  { %303 = vrot.lane.b32.xlu0 %v300_v53, %s1406_s3  ;;  %311 = vrot.lane.b32.xlu1 %v300_v53, %s1409_s2 }
 0x21c   :  { %309 = vrot.lane.b32.xlu2 %v299_v54, %s1409_s2 }
 0x223   :  { %669 = vrot.lane.b32.xlu1 %v1705_v0, %s1409_s2  ;;  %661 = vrot.lane.b32.xlu0 %v1705_v0, %s1406_s3 }
 0x224   :  { %301 = vrot.lane.b32.xlu2 %v299_v54, %s1406_s3 }
 0x22b   :  { %663 = vrot.lane.b32.xlu1 %v1711_v1, %s1406_s3 }
 0x22c   :  { %671 = vrot.lane.b32.xlu2 %v1711_v1, %s1409_s2 }
 0x276   :  { %v310_v55 = vpop.permute.xlu2 %309 }
 0x27e   :  { %v302_v60 = vpop.permute.xlu2 %301 }
 0x286   :  { %v672_v11 = vpop.permute.xlu2 %671 }
 0x28d   :  { %v312_v56 = vpop.permute.xlu1 %311  ;;  %v304_v59 = vpop.permute.xlu0 %303 }
 0x28e   :  { %v313_v57 = vsel %vm121_vm0, %v310_v55, %v312_v56  ;;  %v314_v58 = vsel %vm121_vm0, %v312_v56, %v310_v55  ;;  %v306_v62 = vsel %vm108_vm2, %v304_v59, %v302_v60  ;;  %v305_v63 = vsel %vm108_vm2, %v302_v60, %v304_v59 }
 0x28f   :  { %333 = vmatpush.msrb.mxu2 %v313_v57  ;;  %1197 = vmatpush.msk.msrb.mxu3 %vm101_vm1, %v314_v58 }
 0x291   :  { %334 = vmatpush.msrb.mxu2 %v299_v54  ;;  %354 = vmatpush.msrb.mxu3 %v300_v53 }
 0x293   :  { %1195 = vmatpush.msk.msrb.mxu2 %vm98_vm3, %v306_v62  ;;  %355 = vmatpush.msrb.mxu3 %v305_v63 }
 0x294   :  { %1196 = vmatmul.msk.f32.vlgmr.msrb.gmra.mxu2 %vm130_vm4, %v1629_v61  ;;  %1198 = vmatmul.msk.f32.vlgmr.msrb.gmra.mxu3 %vm130_vm4, %v1629_v61 }
 0x295   :  { %402 = vmatpush.msra.mxu2 %v1410_v2  ;;  %422 = vmatpush.msra.mxu3 %v1410_v2  ;;  %v670_v10 = vpop.permute.xlu1 %669  ;;  %v662_v15 = vpop.permute.xlu0 %661 }
 0x296   :  { %v673_v13 = vsel %vm121_vm0, %v670_v10, %v672_v11  ;;  %v674_v14 = vsel %vm121_vm0, %v672_v11, %v670_v10 }
 0x297   :  { %403 = vmatpush.msra.mxu2 %v1410_v2  ;;  %423 = vmatpush.msra.mxu3 %v1410_v2 }
 0x299   :  { %404 = vmatpush.msra.mxu2 %v1410_v2  ;;  %424 = vmatpush.msra.mxu3 %v1410_v2 }
 0x29b   :  { %405 = vmatpush.msra.mxu2 %v1410_v2  ;;  %425 = vmatpush.msra.mxu3 %v1410_v2 }
 0x29d   :  { %406 = vmatpush.msra.mxu2 %v1410_v2  ;;  %426 = vmatpush.msra.mxu3 %v1410_v2  ;;  %v664_v16 = vpop.permute.xlu1 %663 }
 0x29e   :  { %v666_v17 = vsel %vm108_vm2, %v664_v16, %v662_v15  ;;  %v665_v18 = vsel %vm108_vm2, %v662_v15, %v664_v16 }
 0x29f   :  { %407 = vmatpush.msra.mxu2 %v1410_v2  ;;  %427 = vmatpush.msra.mxu3 %v1410_v2 }
 0x2a1   :  { %408 = vmatpush.msra.mxu2 %v1410_v2  ;;  %428 = vmatpush.msra.mxu3 %v1410_v2 }
 0x2a3   :  { %409 = vmatpush.msra.mxu2 %v1410_v2  ;;  %429 = vmatpush.msra.mxu3 %v1410_v2 }
 0x2a5   :  { %410 = vmatpush.msra.mxu2 %v1410_v2  ;;  %430 = vmatpush.msra.mxu3 %v1410_v2 }
 0x2a7   :  { %411 = vmatpush.msra.mxu2 %v1410_v2  ;;  %431 = vmatpush.msra.mxu3 %v1410_v2 }
 0x2a9   :  { %412 = vmatpush.msra.mxu2 %v1410_v2  ;;  %432 = vmatpush.msra.mxu3 %v1410_v2 }
 0x2ab   :  { %413 = vmatpush.msra.mxu2 %v1410_v2  ;;  %433 = vmatpush.msra.mxu3 %v1410_v2 }
 0x2ad   :  { %414 = vmatpush.msra.mxu2 %v1410_v2  ;;  %434 = vmatpush.msra.mxu3 %v1410_v2 }
 0x2af   :  { %415 = vmatpush.msra.mxu2 %v1410_v2  ;;  %435 = vmatpush.msra.mxu3 %v1410_v2 }
 0x2b1   :  { %416 = vmatpush.msra.mxu2 %v1410_v2  ;;  %436 = vmatpush.msra.mxu3 %v1410_v2 }
 0x2b3   :  { %417 = vmatpush.msra.mxu2 %v1410_v2  ;;  %437 = vmatpush.msra.mxu3 %v1410_v2 }
 0x2b5   :  { %528 = vmatpush.msrb.mxu2 %v1410_v2  ;;  %548 = vmatpush.msrb.mxu3 %v1410_v2 }
 0x2b7   :  { %529 = vmatpush.msrb.mxu2 %v1410_v2  ;;  %549 = vmatpush.msrb.mxu3 %v1410_v2 }
 0x2b9   :  { %530 = vmatpush.msrb.mxu2 %v1410_v2  ;;  %550 = vmatpush.msrb.mxu3 %v1410_v2 }
 0x2bb   :  { %531 = vmatpush.msrb.mxu2 %v1410_v2  ;;  %551 = vmatpush.msrb.mxu3 %v1410_v2 }
 0x2bd   :  { %532 = vmatpush.msrb.mxu2 %v1410_v2  ;;  %552 = vmatpush.msrb.mxu3 %v1410_v2 }
 0x2bf   :  { %533 = vmatpush.msrb.mxu2 %v1410_v2  ;;  %553 = vmatpush.msrb.mxu3 %v1410_v2 }
 0x2c1   :  { %534 = vmatpush.msrb.mxu2 %v1410_v2  ;;  %554 = vmatpush.msrb.mxu3 %v1410_v2 }
 0x2c3   :  { %535 = vmatpush.msrb.mxu2 %v1410_v2  ;;  %555 = vmatpush.msrb.mxu3 %v1410_v2 }
 0x2c5   :  { %536 = vmatpush.msrb.mxu2 %v1410_v2  ;;  %556 = vmatpush.msrb.mxu3 %v1410_v2 }
 0x2c7   :  { %537 = vmatpush.msrb.mxu2 %v1410_v2  ;;  %557 = vmatpush.msrb.mxu3 %v1410_v2 }
 0x2c9   :  { %538 = vmatpush.msrb.mxu2 %v1410_v2  ;;  %558 = vmatpush.msrb.mxu3 %v1410_v2 }
 0x2cb   :  { %539 = vmatpush.msrb.mxu2 %v1410_v2  ;;  %559 = vmatpush.msrb.mxu3 %v1410_v2 }
 0x2cd   :  { %540 = vmatpush.msrb.mxu2 %v1410_v2  ;;  %560 = vmatpush.msrb.mxu3 %v1410_v2 }
 0x2cf   :  { %541 = vmatpush.msrb.mxu2 %v1410_v2  ;;  %561 = vmatpush.msrb.mxu3 %v1410_v2 }
 0x2d1   :  { %542 = vmatpush.msrb.mxu2 %v1410_v2  ;;  %562 = vmatpush.msrb.mxu3 %v1410_v2 }
 0x2d3   :  { %543 = vmatpush.msrb.mxu2 %v1410_v2  ;;  %563 = vmatpush.msrb.mxu3 %v1410_v2 }
 0x317   :  { %v1717_v3 = vpop.f32.mrf.mxu2  ;;  %v1719_v5 = vpop.f32.mrf.mxu3 }
 0x318   :  { %v400_v6 = vmul.f32 %v1717_v3, %v1717_v3  ;;  %v401_v8 = vmul.f32 %v1719_v5, %v1719_v5  ;;  %376 = vmatmul.f32.vlgmr.msra.gmra.mxu0 %v1717_v3  ;;  %396 = vmatmul.f32.vlgmr.msra.gmra.mxu1 %v1719_v5 }
 0x319   :  { %570 = vmatpush.msra.mxu0 %v1410_v2  ;;  %590 = vmatpush.msra.mxu1 %v1410_v2 }
 0x31a   :  { %418 = vmatmul.f32.vlgmr.msra.gmra.mxu2 %v400_v6  ;;  %438 = vmatmul.f32.vlgmr.msra.gmra.mxu3 %v401_v8 }
 0x31b   :  { %571 = vmatpush.msra.mxu0 %v1410_v2  ;;  %591 = vmatpush.msra.mxu1 %v1410_v2 }
 0x31c   :  { %690 = vmatpush.msra.mxu2 %v673_v13  ;;  %1203 = vmatpush.msk.msra.mxu3 %vm101_vm1, %v674_v14  ;;  %v1413_v13 = vmov 2  }
 0x31d   :  { %572 = vmatpush.msra.mxu0 %v1410_v2  ;;  %592 = vmatpush.msra.mxu1 %v1410_v2 }
 0x31e   :  { %691 = vmatpush.msra.mxu2 %v1705_v0  ;;  %711 = vmatpush.msra.mxu3 %v1711_v1 }
 0x31f   :  { %573 = vmatpush.msra.mxu0 %v1410_v2  ;;  %593 = vmatpush.msra.mxu1 %v1410_v2 }
 0x320   :  { %1199 = vmatmul.msk.f32.vlgmr.msrb.gmra.mxu0 %vm484_vm8, %v1731_v9  ;;  %1200 = vmatmul.msk.f32.vlgmr.msrb.gmra.mxu1 %vm484_vm8, %v1731_v9 }
 0x321   :  { %574 = vmatpush.msra.mxu0 %v1410_v2  ;;  %594 = vmatpush.msra.mxu1 %v1410_v2 }
 0x322   :  { %1201 = vmatpush.msk.msra.mxu2 %vm98_vm3, %v666_v17  ;;  %712 = vmatpush.msra.mxu3 %v665_v18 }
 0x323   :  { %575 = vmatpush.msra.mxu0 %v1410_v2  ;;  %595 = vmatpush.msra.mxu1 %v1410_v2 }
 0x324   :  { %1230 = vset.pattern.permute.xlu1 %v1413_v13 }
 0x325   :  { %576 = vmatpush.msra.mxu0 %v1410_v2  ;;  %596 = vmatpush.msra.mxu1 %v1410_v2 }
 0x327   :  { %577 = vmatpush.msra.mxu0 %v1410_v2  ;;  %597 = vmatpush.msra.mxu1 %v1410_v2 }
 0x329   :  { %578 = vmatpush.msra.mxu0 %v1410_v2  ;;  %598 = vmatpush.msra.mxu1 %v1410_v2 }
 0x32b   :  { %579 = vmatpush.msra.mxu0 %v1410_v2  ;;  %599 = vmatpush.msra.mxu1 %v1410_v2 }
 0x32d   :  { %580 = vmatpush.msra.mxu0 %v1410_v2  ;;  %600 = vmatpush.msra.mxu1 %v1410_v2 }
 0x32f   :  { %581 = vmatpush.msra.mxu0 %v1410_v2  ;;  %601 = vmatpush.msra.mxu1 %v1410_v2 }
 0x331   :  { %582 = vmatpush.msra.mxu0 %v1410_v2  ;;  %602 = vmatpush.msra.mxu1 %v1410_v2 }
 0x333   :  { %583 = vmatpush.msra.mxu0 %v1410_v2  ;;  %603 = vmatpush.msra.mxu1 %v1410_v2 }
 0x335   :  { %584 = vmatpush.msra.mxu0 %v1410_v2  ;;  %604 = vmatpush.msra.mxu1 %v1410_v2 }
 0x337   :  { %585 = vmatpush.msra.mxu0 %v1410_v2  ;;  %605 = vmatpush.msra.mxu1 %v1410_v2 }
 0x339   :  { %717 = vmatpush.msrb.mxu0 %v1410_v2  ;;  %737 = vmatpush.msrb.mxu1 %v1410_v2 }
 0x33b   :  { %718 = vmatpush.msrb.mxu0 %v1410_v2  ;;  %738 = vmatpush.msrb.mxu1 %v1410_v2 }
 0x33d   :  { %719 = vmatpush.msrb.mxu0 %v1410_v2  ;;  %739 = vmatpush.msrb.mxu1 %v1410_v2 }
 0x33f   :  { %720 = vmatpush.msrb.mxu0 %v1410_v2  ;;  %740 = vmatpush.msrb.mxu1 %v1410_v2 }
 0x341   :  { %721 = vmatpush.msrb.mxu0 %v1410_v2  ;;  %741 = vmatpush.msrb.mxu1 %v1410_v2 }
 0x343   :  { %722 = vmatpush.msrb.mxu0 %v1410_v2  ;;  %742 = vmatpush.msrb.mxu1 %v1410_v2 }
 0x345   :  { %723 = vmatpush.msrb.mxu0 %v1410_v2  ;;  %743 = vmatpush.msrb.mxu1 %v1410_v2 }
 0x347   :  { %724 = vmatpush.msrb.mxu0 %v1410_v2  ;;  %744 = vmatpush.msrb.mxu1 %v1410_v2 }
 0x349   :  { %725 = vmatpush.msrb.mxu0 %v1410_v2  ;;  %745 = vmatpush.msrb.mxu1 %v1410_v2 }
 0x34b   :  { %726 = vmatpush.msrb.mxu0 %v1410_v2  ;;  %746 = vmatpush.msrb.mxu1 %v1410_v2 }
 0x34d   :  { %727 = vmatpush.msrb.mxu0 %v1410_v2  ;;  %747 = vmatpush.msrb.mxu1 %v1410_v2 }
 0x34f   :  { %728 = vmatpush.msrb.mxu0 %v1410_v2  ;;  %748 = vmatpush.msrb.mxu1 %v1410_v2 }
 0x351   :  { %729 = vmatpush.msrb.mxu0 %v1410_v2  ;;  %749 = vmatpush.msrb.mxu1 %v1410_v2 }
 0x353   :  { %730 = vmatpush.msrb.mxu0 %v1410_v2  ;;  %750 = vmatpush.msrb.mxu1 %v1410_v2 }
 0x355   :  { %731 = vmatpush.msrb.mxu0 %v1410_v2  ;;  %751 = vmatpush.msrb.mxu1 %v1410_v2 }
 0x357   :  { %732 = vmatpush.msrb.mxu0 %v1410_v2  ;;  %752 = vmatpush.msrb.mxu1 %v1410_v2 }
 0x395   :  { %v377_v21 = vpop.f32.mrf.mxu0  ;;  %v397_v22 = vpop.f32.mrf.mxu1 }
 0x396   :  { %v1811_v23 = vadd.f32 %v397_v22, %v377_v21 }
 0x398   :  { %v442_v60 = vmul.f32 0.00390625, %v1811_v23 }
 0x39a   :  { %v444_v63 = vmul.f32 %v442_v60, %v442_v60 }
 0x39d   :  { %v1813_v24 = vpop.f32.mrf.mxu0  ;;  %v1815_v25 = vpop.f32.mrf.mxu1 }
 0x39e   :  { %v568_v26 = vmul.f32 %v1813_v24, %v1813_v24  ;;  %v569_v27 = vmul.f32 %v1815_v25, %v1815_v25  ;;  %544 = vmatmul.f32.vlgmr.msrb.gmra.mxu2 %v1813_v24  ;;  %564 = vmatmul.f32.vlgmr.msrb.gmra.mxu3 %v1815_v25  ;;  %v439_v28 = vpop.f32.mrf.mxu3 }
 0x39f   :  { %759 = vmatpush.msrb.mxu2 %v1410_v2  ;;  %779 = vmatpush.msrb.mxu3 %v1410_v2 }
 0x3a0   :  { %586 = vmatmul.f32.vlgmr.msra.gmra.mxu0 %v568_v26  ;;  %606 = vmatmul.f32.vlgmr.msra.gmra.mxu1 %v569_v27 }
 0x3a1   :  { %760 = vmatpush.msrb.mxu2 %v1410_v2  ;;  %780 = vmatpush.msrb.mxu3 %v1410_v2 }
 0x3a3   :  { %761 = vmatpush.msrb.mxu2 %v1410_v2  ;;  %781 = vmatpush.msrb.mxu3 %v1410_v2 }
 0x3a5   :  { %762 = vmatpush.msrb.mxu2 %v1410_v2  ;;  %782 = vmatpush.msrb.mxu3 %v1410_v2 }
 0x3a6   :  { %1202 = vmatmul.msk.f32.vlgmr.msra.gmra.mxu2 %vm130_vm4, %v1523_v12  ;;  %1204 = vmatmul.msk.f32.vlgmr.msra.gmra.mxu3 %vm130_vm4, %v1523_v12  ;;  %v419_v12 = vpop.f32.mrf.mxu2 }
 0x3a7   :  { %763 = vmatpush.msrb.mxu2 %v1410_v2  ;;  %783 = vmatpush.msrb.mxu3 %v1410_v2  ;;  %v440_v59 = vadd.f32 %v439_v28, %v419_v12 }
 0x3a9   :  { %764 = vmatpush.msrb.mxu2 %v1410_v2  ;;  %784 = vmatpush.msrb.mxu3 %v1410_v2  ;;  %v443_v62 = vmul.f32 0.00390625, %v440_v59 }
 0x3ab   :  { %765 = vmatpush.msrb.mxu2 %v1410_v2  ;;  %785 = vmatpush.msrb.mxu3 %v1410_v2 }
 0x3ad   :  { %766 = vmatpush.msrb.mxu2 %v1410_v2  ;;  %786 = vmatpush.msrb.mxu3 %v1410_v2 }
 0x3af   :  { %767 = vmatpush.msrb.mxu2 %v1410_v2  ;;  %787 = vmatpush.msrb.mxu3 %v1410_v2 }
 0x3b1   :  { %768 = vmatpush.msrb.mxu2 %v1410_v2  ;;  %788 = vmatpush.msrb.mxu3 %v1410_v2 }
 0x3b3   :  { %769 = vmatpush.msrb.mxu2 %v1410_v2  ;;  %789 = vmatpush.msrb.mxu3 %v1410_v2 }
 0x3b5   :  { %770 = vmatpush.msrb.mxu2 %v1410_v2  ;;  %790 = vmatpush.msrb.mxu3 %v1410_v2 }
 0x3b7   :  { %771 = vmatpush.msrb.mxu2 %v1410_v2  ;;  %791 = vmatpush.msrb.mxu3 %v1410_v2 }
 0x3b9   :  { %772 = vmatpush.msrb.mxu2 %v1410_v2  ;;  %792 = vmatpush.msrb.mxu3 %v1410_v2 }
 0x3bb   :  { %773 = vmatpush.msrb.mxu2 %v1410_v2  ;;  %793 = vmatpush.msrb.mxu3 %v1410_v2 }
 0x3bd   :  { %774 = vmatpush.msrb.mxu2 %v1410_v2  ;;  %794 = vmatpush.msrb.mxu3 %v1410_v2 }
 0x3bf   :  { %891 = vmatpush.msra.mxu2 %v1410_v2  ;;  %911 = vmatpush.msra.mxu3 %v1410_v2 }
 0x3c1   :  { %892 = vmatpush.msra.mxu2 %v1410_v2  ;;  %912 = vmatpush.msra.mxu3 %v1410_v2 }
 0x3c3   :  { %893 = vmatpush.msra.mxu2 %v1410_v2  ;;  %913 = vmatpush.msra.mxu3 %v1410_v2 }
 0x3c5   :  { %894 = vmatpush.msra.mxu2 %v1410_v2  ;;  %914 = vmatpush.msra.mxu3 %v1410_v2 }
 0x3c7   :  { %895 = vmatpush.msra.mxu2 %v1410_v2  ;;  %915 = vmatpush.msra.mxu3 %v1410_v2 }
 0x3c9   :  { %896 = vmatpush.msra.mxu2 %v1410_v2  ;;  %916 = vmatpush.msra.mxu3 %v1410_v2 }
 0x3cb   :  { %897 = vmatpush.msra.mxu2 %v1410_v2  ;;  %917 = vmatpush.msra.mxu3 %v1410_v2 }
 0x3cd   :  { %898 = vmatpush.msra.mxu2 %v1410_v2  ;;  %918 = vmatpush.msra.mxu3 %v1410_v2 }
 0x3cf   :  { %899 = vmatpush.msra.mxu2 %v1410_v2  ;;  %919 = vmatpush.msra.mxu3 %v1410_v2 }
 0x3d1   :  { %900 = vmatpush.msra.mxu2 %v1410_v2  ;;  %920 = vmatpush.msra.mxu3 %v1410_v2 }
 0x3d3   :  { %901 = vmatpush.msra.mxu2 %v1410_v2  ;;  %921 = vmatpush.msra.mxu3 %v1410_v2 }
 0x3d5   :  { %902 = vmatpush.msra.mxu2 %v1410_v2  ;;  %922 = vmatpush.msra.mxu3 %v1410_v2 }
 0x3d7   :  { %903 = vmatpush.msra.mxu2 %v1410_v2  ;;  %923 = vmatpush.msra.mxu3 %v1410_v2 }
 0x3d9   :  { %904 = vmatpush.msra.mxu2 %v1410_v2  ;;  %924 = vmatpush.msra.mxu3 %v1410_v2 }
 0x3db   :  { %905 = vmatpush.msra.mxu2 %v1410_v2  ;;  %925 = vmatpush.msra.mxu3 %v1410_v2 }
 0x3dd   :  { %906 = vmatpush.msra.mxu2 %v1410_v2  ;;  %926 = vmatpush.msra.mxu3 %v1410_v2 }
 0x41d   :  { %v587_v36 = vpop.f32.mrf.mxu0  ;;  %v607_v37 = vpop.f32.mrf.mxu1 }
 0x41e   :  { %v608_v10 = vadd.f32 %v607_v37, %v587_v36 }
 0x420   :  { %v611_v14 = vmul.f32 0.00390625, %v608_v10 }
 0x421   :  { %v545_v29 = vpop.f32.mrf.mxu2  ;;  %v565_v30 = vpop.f32.mrf.mxu3 }
 0x422   :  { %v566_v31 = vadd.f32 %v565_v30, %v545_v29 }
 0x424   :  { %v610_v8 = vmul.f32 0.00390625, %v566_v31 }
 0x426   :  { %v612_v11 = vmul.f32 %v610_v8, %v610_v8 }
 0x428   :  { %v613_v15 = vsub.f32 %v611_v14, %v612_v11 }
 0x429   :  { %v694_v32 = vpop.f32.mrf.mxu2  ;;  %v714_v33 = vpop.f32.mrf.mxu3 }
 0x42a   :  { %v757_v34 = vmul.f32 %v694_v32, %v694_v32  ;;  %v758_v35 = vmul.f32 %v714_v33, %v714_v33  ;;  %733 = vmatmul.f32.vlgmr.msrb.gmra.mxu0 %v694_v32  ;;  %753 = vmatmul.f32.vlgmr.msrb.gmra.mxu1 %v714_v33  ;;  %v614_v17 = vmax.f32 %v613_v15, 0.0 }
 0x42c   :  { %775 = vmatmul.f32.vlgmr.msrb.gmra.mxu2 %v757_v34  ;;  %795 = vmatmul.f32.vlgmr.msrb.gmra.mxu3 %v758_v35  ;;  %v622_v22 = vadd.f32 1e-05, %v614_v17 }
 0x42d   :  { %1022 = vmatpush.msrb.mxu2 %v1705_v0  ;;  %1042 = vmatpush.msrb.mxu3 %v1711_v1  ;;  %v445_v0 = vsub.f32 %v443_v62, %v444_v63 }
 0x42e   :  { %vm629_vm5 = vweird.f32 %v622_v22 }
 0x42f   :  { %v446_v1 = vmax.f32 %v445_v0, 0.0 }
 0x431   :  { %v454_v6 = vadd.f32 1e-05, %v446_v1 }
 0x433   :  { %vm461_vm13 = vweird.f32 %v454_v6 }
 0x4a7   :  { %v734_v38 = vpop.f32.mrf.mxu0  ;;  %v754_v39 = vpop.f32.mrf.mxu1 }
 0x4a8   :  { %v755_v40 = vadd.f32 %v754_v39, %v734_v38 }
 0x4aa   :  { %v799_v41 = vmul.f32 0.00390625, %v755_v40 }
 0x4ac   :  { %806 = vperm.xlu2 %1227, %v799_v41   ;;  %v801_v46 = vmul.f32 %v799_v41, %v799_v41 }
 0x4af   :  { %v776_v42 = vpop.f32.mrf.mxu2  ;;  %v796_v43 = vpop.f32.mrf.mxu3 }
 0x4b0   :  { %v797_v44 = vadd.f32 %v796_v43, %v776_v42  ;;  %v1414_v43 = vmov 3  }
 0x4b2   :  { %v800_v47 = vmul.f32 0.00390625, %v797_v44 }
 0x4b4   :  { %v802_v49 = vsub.f32 %v800_v47, %v801_v46  ;;  %v1415_v47 = vmov 4  }
 0x4b6   :  { %v803_v50 = vmax.f32 %v802_v49, 0.0 }
 0x4b8   :  { %v811_v51 = vadd.f32 1e-05, %v803_v50 }
 0x4ba   :  { %1239 = vrsqrt.f32 %v811_v51  ;;  %vm818_vm10 = vweird.f32 %v811_v51 }
 0x4bb   :  { %1241 = vrsqrt.f32 %v454_v6 }
 0x4bc   :  { %1243 = vrsqrt.f32 %v622_v22 }
 0x4c0   :  { %v1240_v52 = vpop.eup %1239 }
 0x4c1   :  { %v813_v53 = vmul.f32 %v1240_v52, %v811_v51  ;;  %vm819_vm9 = vweird.f32 %v1240_v52  ;;  %v1242_v16 = vpop.eup %1241 }
 0x4c2   :  { %vm820_vm11 = vmor %vm818_vm10, %vm819_vm9  ;;  %v456_v18 = vmul.f32 %v1242_v16, %v454_v6  ;;  %v1244_v40 = vpop.eup %1243  ;;  %vm462_vm12 = vweird.f32 %v1242_v16 }
 0x4c3   :  { %v814_v54 = vmul.f32 %v1240_v52, %v813_v53  ;;  %vm463_vm14 = vmor %vm461_vm13, %vm462_vm12  ;;  %vm630_vm15 = vweird.f32 %v1244_v40 }
 0x4c4   :  { %v457_v12 = vmul.f32 %v1242_v16, %v456_v18  ;;  %vm631_vm6 = vmor %vm629_vm5, %vm630_vm15 }
 0x4c5   :  { %v815_v55 = vmul.f32 0.5, %v814_v54 }
 0x4c6   :  { %v458_v34 = vmul.f32 0.5, %v457_v12 }
 0x4c7   :  { %v816_v56 = vsub.f32 1.5, %v815_v55 }
 0x4c8   :  { %v459_v39 = vsub.f32 1.5, %v458_v34 }
 0x4c9   :  { %v817_v57 = vmul.f32 %v1240_v52, %v816_v56 }
 0x4cb   :  { %v821_v58 = vsel %vm820_vm11, %v1240_v52, %v817_v57 }
 0x4cc   :  { %824 = vperm.xlu0 %1228, %v821_v58  }
 0x506   :  { %v807_v21 = vpop.permute.xlu2 %806 }
 0x507   :  { %v809_v26 = vsub.f32 %v694_v32, %v807_v21  ;;  %v810_v23 = vsub.f32 %v714_v33, %v807_v21  ;;  %v624_v32 = vmul.f32 %v1244_v40, %v622_v22  ;;  %v460_v33 = vmul.f32 %v1242_v16, %v459_v39 }
 0x509   :  { %v625_v41 = vmul.f32 %v1244_v40, %v624_v32 }
 0x53e   :  { %v825_v27 = vpop.permute.xlu0 %824 }
 0x53f   :  { %v827_v28 = vmul.f32 %v825_v27, %v809_v26  ;;  %v828_v29 = vmul.f32 %v825_v27, %v810_v23  ;;  %v1416_v26 = vmov 5   ;;  %v1249_v23 = vld [vmem:[#allocation10] sm:$0xff] }
 0x541   :  { %v829_v30 = vmul.f32 %v827_v28, %v1611_v45  ;;  %v830_v31 = vmul.f32 %v828_v29, %v1611_v45  ;;  %v464_v45 = vsel %vm463_vm14, %v1242_v16, %v460_v33 }
 0x543   :  { %v832_v35 = vadd.f32 %v830_v31, %v1613_v48  ;;  %v831_v36 = vadd.f32 %v829_v30, %v1613_v48  ;;  %v626_v48 = vmul.f32 0.5, %v625_v41 }
 0x545   :  { %v834_v37 = vmax.f32 %v832_v35, 0.0  ;;  %v833_v38 = vmax.f32 %v831_v36, 0.0  ;;  %v627_v42 = vsub.f32 1.5, %v626_v48 }
 0x547   :  { %845 = vrot.lane.b32.xlu2 %v834_v37, %s1409_s2  ;;  %835 = vrot.lane.b32.xlu0 %v833_v38, %s1406_s3  ;;  %v628_v44 = vmul.f32 %v1244_v40, %v627_v42 }
 0x548   :  { %843 = vrot.lane.b32.xlu1 %v833_v38, %s1409_s2 }
 0x549   :  { %v632_v46 = vsel %vm631_vm6, %v1244_v40, %v628_v44 }
 0x54f   :  { %449 = vperm.xlu2 %1227, %v442_v60   ;;  %467 = vperm.xlu0 %1228, %v464_v45  }
 0x550   :  { %837 = vrot.lane.b32.xlu1 %v834_v37, %s1406_s3 }
 0x557   :  { %617 = vperm.xlu0 %1228, %v610_v8   ;;  %1231 = vset.pattern.permute.xlu2 %v1414_v43 }
 0x558   :  { %473 = vperm.xlu1 %1230, %v1607_v20   ;;  %479 = vperm.xlu2 %1231, %v1607_v20  }
 0x55f   :  { %635 = vperm.xlu0 %1228, %v632_v46  }
 0x560   :  { %1232 = vset.pattern.permute.xlu1 %v1411_v19  ;;  %1233 = vset.pattern.permute.xlu2 %v1411_v19 }
 0x567   :  { %1234 = vset.pattern.permute.xlu0 %v1415_v47 }
 0x568   :  { %641 = vperm.xlu0 %1234, %v1607_v20  }
 0x570   :  { %1236 = vset.pattern.permute.xlu0 %v1411_v19 }
 0x5a1   :  { %v846_v49 = vpop.permute.xlu2 %845 }
 0x5a9   :  { %v450_v39 = vpop.permute.xlu2 %449 }
 0x5aa   :  { %v452_v42 = vsub.f32 %v1717_v3, %v450_v39  ;;  %v453_v46 = vsub.f32 %v1719_v5, %v450_v39 }
 0x5b9   :  { %v836_v53 = vpop.permute.xlu0 %835 }
 0x5ba   :  { %v844_v50 = vpop.permute.xlu1 %843 }
 0x5bb   :  { %v847_v51 = vsel %vm121_vm0, %v844_v50, %v846_v49  ;;  %v848_v52 = vsel %vm121_vm0, %v846_v49, %v844_v50 }
 0x5bc   :  { %864 = vmatpush.msra.mxu0 %v847_v51  ;;  %1207 = vmatpush.msk.msra.mxu1 %vm101_vm1, %v848_v52 }
 0x5be   :  { %865 = vmatpush.msra.mxu0 %v833_v38  ;;  %885 = vmatpush.msra.mxu1 %v834_v37 }
 0x5c1   :  { %v468_v27 = vpop.permute.xlu0 %467 }
 0x5c2   :  { %v838_v54 = vpop.permute.xlu1 %837  ;;  %v470_v49 = vmul.f32 %v468_v27, %v452_v42  ;;  %v471_v50 = vmul.f32 %v468_v27, %v453_v46 }
 0x5c3   :  { %v840_v20 = vsel %vm108_vm2, %v838_v54, %v836_v53  ;;  %v839_v19 = vsel %vm108_vm2, %v836_v53, %v838_v54 }
 0x5c4   :  { %1205 = vmatpush.msk.msra.mxu0 %vm98_vm3, %v840_v20  ;;  %886 = vmatpush.msra.mxu1 %v839_v19 }
 0x5c5   :  { %1206 = vmatmul.msk.f32.vlgmr.msra.gmra.mxu0 %vm130_vm4, %v1629_v61  ;;  %1208 = vmatmul.msk.f32.vlgmr.msra.gmra.mxu1 %vm130_vm4, %v1629_v61 }
 0x5c6   :  { %933 = vmatpush.msrb.mxu0 %v1410_v2  ;;  %953 = vmatpush.msrb.mxu1 %v1410_v2 }
 0x5c8   :  { %934 = vmatpush.msrb.mxu0 %v1410_v2  ;;  %954 = vmatpush.msrb.mxu1 %v1410_v2 }
 0x5c9   :  { %v618_v28 = vpop.permute.xlu0 %617 }
 0x5ca   :  { %935 = vmatpush.msrb.mxu0 %v1410_v2  ;;  %955 = vmatpush.msrb.mxu1 %v1410_v2  ;;  %v2044_v12 = vpop.permute.xlu1 %473  ;;  %v620_v51 = vsub.f32 %v1813_v24, %v618_v28  ;;  %v621_v52 = vsub.f32 %v1815_v25, %v618_v28 }
 0x5cb   :  { %v476_v54 = vmul.f32 %v2044_v12, %v470_v49  ;;  %v477_v19 = vmul.f32 %v2044_v12, %v471_v50 }
 0x5cc   :  { %936 = vmatpush.msrb.mxu0 %v1410_v2  ;;  %956 = vmatpush.msrb.mxu1 %v1410_v2 }
 0x5ce   :  { %937 = vmatpush.msrb.mxu0 %v1410_v2  ;;  %957 = vmatpush.msrb.mxu1 %v1410_v2 }
 0x5d0   :  { %938 = vmatpush.msrb.mxu0 %v1410_v2  ;;  %958 = vmatpush.msrb.mxu1 %v1410_v2 }
 0x5d1   :  { %v636_v36 = vpop.permute.xlu0 %635 }
 0x5d2   :  { %939 = vmatpush.msrb.mxu0 %v1410_v2  ;;  %959 = vmatpush.msrb.mxu1 %v1410_v2 }
 0x5d4   :  { %940 = vmatpush.msrb.mxu0 %v1410_v2  ;;  %960 = vmatpush.msrb.mxu1 %v1410_v2 }
 0x5d6   :  { %941 = vmatpush.msrb.mxu0 %v1410_v2  ;;  %961 = vmatpush.msrb.mxu1 %v1410_v2 }
 0x5d8   :  { %942 = vmatpush.msrb.mxu0 %v1410_v2  ;;  %962 = vmatpush.msrb.mxu1 %v1410_v2 }
 0x5da   :  { %943 = vmatpush.msrb.mxu0 %v1410_v2  ;;  %963 = vmatpush.msrb.mxu1 %v1410_v2  ;;  %v642_v20 = vpop.permute.xlu0 %641 }
 0x5dc   :  { %944 = vmatpush.msrb.mxu0 %v1410_v2  ;;  %964 = vmatpush.msrb.mxu1 %v1410_v2 }
 0x5de   :  { %945 = vmatpush.msrb.mxu0 %v1410_v2  ;;  %965 = vmatpush.msrb.mxu1 %v1410_v2 }
 0x5e0   :  { %946 = vmatpush.msrb.mxu0 %v1410_v2  ;;  %966 = vmatpush.msrb.mxu1 %v1410_v2 }
 0x5e2   :  { %947 = vmatpush.msrb.mxu0 %v1410_v2  ;;  %967 = vmatpush.msrb.mxu1 %v1410_v2 }
 0x5e4   :  { %948 = vmatpush.msrb.mxu0 %v1410_v2  ;;  %968 = vmatpush.msrb.mxu1 %v1410_v2 }
 0x5e6   :  { %1047 = vmatpush.msra.mxu0 %v1410_v2  ;;  %1067 = vmatpush.msra.mxu1 %v1410_v2 }
 0x5e8   :  { %1048 = vmatpush.msra.mxu0 %v1410_v2  ;;  %1068 = vmatpush.msra.mxu1 %v1410_v2 }
 0x5ea   :  { %1049 = vmatpush.msra.mxu0 %v1410_v2  ;;  %1069 = vmatpush.msra.mxu1 %v1410_v2 }
 0x5ec   :  { %1050 = vmatpush.msra.mxu0 %v1410_v2  ;;  %1070 = vmatpush.msra.mxu1 %v1410_v2 }
 0x5ee   :  { %1051 = vmatpush.msra.mxu0 %v1410_v2  ;;  %1071 = vmatpush.msra.mxu1 %v1410_v2 }
 0x5f0   :  { %1052 = vmatpush.msra.mxu0 %v1410_v2  ;;  %1072 = vmatpush.msra.mxu1 %v1410_v2 }
 0x5f2   :  { %1053 = vmatpush.msra.mxu0 %v1410_v2  ;;  %1073 = vmatpush.msra.mxu1 %v1410_v2 }
 0x5f4   :  { %1054 = vmatpush.msra.mxu0 %v1410_v2  ;;  %1074 = vmatpush.msra.mxu1 %v1410_v2 }
 0x5f6   :  { %1055 = vmatpush.msra.mxu0 %v1410_v2  ;;  %1075 = vmatpush.msra.mxu1 %v1410_v2 }
 0x5f8   :  { %1056 = vmatpush.msra.mxu0 %v1410_v2  ;;  %1076 = vmatpush.msra.mxu1 %v1410_v2 }
 0x5fa   :  { %1057 = vmatpush.msra.mxu0 %v1410_v2  ;;  %1077 = vmatpush.msra.mxu1 %v1410_v2 }
 0x5fc   :  { %1058 = vmatpush.msra.mxu0 %v1410_v2  ;;  %1078 = vmatpush.msra.mxu1 %v1410_v2 }
 0x5fe   :  { %1059 = vmatpush.msra.mxu0 %v1410_v2  ;;  %1079 = vmatpush.msra.mxu1 %v1410_v2 }
 0x600   :  { %1060 = vmatpush.msra.mxu0 %v1410_v2  ;;  %1080 = vmatpush.msra.mxu1 %v1410_v2 }
 0x602   :  { %1061 = vmatpush.msra.mxu0 %v1410_v2  ;;  %1081 = vmatpush.msra.mxu1 %v1410_v2 }
 0x604   :  { %1062 = vmatpush.msra.mxu0 %v1410_v2  ;;  %1082 = vmatpush.msra.mxu1 %v1410_v2 }
 0x642   :  { %v1988_v4 = vpop.f32.mrf.mxu0  ;;  %v1990_v7 = vpop.f32.mrf.mxu1 }
 0x643   :  { %v931_v61 = vmul.f32 %v1988_v4, %v1988_v4  ;;  %v932_v55 = vmul.f32 %v1990_v7, %v1990_v7  ;;  %907 = vmatmul.f32.vlgmr.msra.gmra.mxu2 %v1988_v4  ;;  %927 = vmatmul.f32.vlgmr.msra.gmra.mxu3 %v1990_v7 }
 0x644   :  { %1089 = vmatpush.msra.mxu2 %v1410_v2  ;;  %1109 = vmatpush.msra.mxu3 %v1410_v2 }
 0x645   :  { %949 = vmatmul.f32.vlgmr.msrb.gmra.mxu0 %v931_v61  ;;  %969 = vmatmul.f32.vlgmr.msrb.gmra.mxu1 %v932_v55  ;;  %v480_v61 = vpop.permute.xlu2 %479 }
 0x646   :  { %1090 = vmatpush.msra.mxu2 %v1410_v2  ;;  %1110 = vmatpush.msra.mxu3 %v1410_v2 }
 0x648   :  { %1091 = vmatpush.msra.mxu2 %v1410_v2  ;;  %1111 = vmatpush.msra.mxu3 %v1410_v2 }
 0x64a   :  { %1092 = vmatpush.msra.mxu2 %v1410_v2  ;;  %1112 = vmatpush.msra.mxu3 %v1410_v2 }
 0x64b   :  { %1209 = vmatmul.msk.f32.vlgmr.msrb.gmra.mxu2 %vm484_vm8, %v1731_v9  ;;  %1210 = vmatmul.msk.f32.vlgmr.msrb.gmra.mxu3 %vm484_vm8, %v1731_v9 }
 0x64c   :  { %1093 = vmatpush.msra.mxu2 %v1410_v2  ;;  %1113 = vmatpush.msra.mxu3 %v1410_v2 }
 0x64e   :  { %1094 = vmatpush.msra.mxu2 %v1410_v2  ;;  %1114 = vmatpush.msra.mxu3 %v1410_v2 }
 0x650   :  { %1095 = vmatpush.msra.mxu2 %v1410_v2  ;;  %1115 = vmatpush.msra.mxu3 %v1410_v2 }
 0x652   :  { %1096 = vmatpush.msra.mxu2 %v1410_v2  ;;  %1116 = vmatpush.msra.mxu3 %v1410_v2 }
 0x654   :  { %1097 = vmatpush.msra.mxu2 %v1410_v2  ;;  %1117 = vmatpush.msra.mxu3 %v1410_v2 }
 0x656   :  { %1098 = vmatpush.msra.mxu2 %v1410_v2  ;;  %1118 = vmatpush.msra.mxu3 %v1410_v2 }
 0x658   :  { %1099 = vmatpush.msra.mxu2 %v1410_v2  ;;  %1119 = vmatpush.msra.mxu3 %v1410_v2 }
 0x65a   :  { %1100 = vmatpush.msra.mxu2 %v1410_v2  ;;  %1120 = vmatpush.msra.mxu3 %v1410_v2 }
 0x65c   :  { %1101 = vmatpush.msra.mxu2 %v1410_v2  ;;  %1121 = vmatpush.msra.mxu3 %v1410_v2 }
 0x65e   :  { %1102 = vmatpush.msra.mxu2 %v1410_v2  ;;  %1122 = vmatpush.msra.mxu3 %v1410_v2 }
 0x660   :  { %1103 = vmatpush.msra.mxu2 %v1410_v2  ;;  %1123 = vmatpush.msra.mxu3 %v1410_v2 }
 0x662   :  { %1104 = vmatpush.msra.mxu2 %v1410_v2  ;;  %1124 = vmatpush.msra.mxu3 %v1410_v2 }
 0x6c2   :  { %v950_v9 = vpop.f32.mrf.mxu0  ;;  %v970_v56 = vpop.f32.mrf.mxu1 }
 0x6c3   :  { %v971_v59 = vadd.f32 %v970_v56, %v950_v9  ;;  %v482_v56 = vadd.f32 %v480_v61, %v476_v54 }
 0x6c5   :  { %v974_v63 = vmul.f32 0.00390625, %v971_v59 }
 0x6c6   :  { %v908_v57 = vpop.f32.mrf.mxu2  ;;  %v928_v58 = vpop.f32.mrf.mxu3 }
 0x6c7   :  { %v929_v60 = vadd.f32 %v928_v58, %v908_v57  ;;  %v483_v57 = vadd.f32 %v480_v61, %v477_v19 }
 0x6c9   :  { %v973_v62 = vmul.f32 0.00390625, %v929_v60 }
 0x6cb   :  { %v975_v0 = vmul.f32 %v973_v62, %v973_v62  ;;  %980 = vperm.xlu1 %1232, %v973_v62  }
 0x6cd   :  { %v976_v1 = vsub.f32 %v974_v63, %v975_v0 }
 0x6ce   :  { %v2034_v6 = vpop.f32.mrf.mxu2  ;;  %v2036_v8 = vpop.f32.mrf.mxu3 }
 0x6cf   :  { %v977_v10 = vmax.f32 %v976_v1, 0.0  ;;  %v1087_v11 = vmul.f32 %v2034_v6, %v2034_v6  ;;  %v1088_v2 = vmul.f32 %v2036_v8, %v2036_v8  ;;  %1063 = vmatmul.f32.vlgmr.msra.gmra.mxu0 %v2034_v6  ;;  %1083 = vmatmul.f32.vlgmr.msra.gmra.mxu1 %v2036_v8 }
 0x6d1   :  { %v985_v13 = vadd.f32 1e-05, %v977_v10  ;;  %1105 = vmatmul.f32.vlgmr.msra.gmra.mxu2 %v1087_v11  ;;  %1125 = vmatmul.f32.vlgmr.msra.gmra.mxu3 %v1088_v2 }
 0x6d3   :  { %1245 = vrsqrt.f32 %v985_v13  ;;  %vm992_vm1 = vweird.f32 %v985_v13 }
 0x6d9   :  { %v1246_v14 = vpop.eup %1245 }
 0x6da   :  { %v987_v15 = vmul.f32 %v1246_v14, %v985_v13  ;;  %vm993_vm0 = vweird.f32 %v1246_v14 }
 0x6db   :  { %vm994_vm2 = vmor %vm992_vm1, %vm993_vm0 }
 0x6dc   :  { %v988_v16 = vmul.f32 %v1246_v14, %v987_v15 }
 0x6de   :  { %v989_v17 = vmul.f32 0.5, %v988_v16 }
 0x6e0   :  { %v990_v18 = vsub.f32 1.5, %v989_v17 }
 0x6e2   :  { %v991_v21 = vmul.f32 %v1246_v14, %v990_v18 }
 0x6e4   :  { %v995_v22 = vsel %vm994_vm2, %v1246_v14, %v991_v21 }
 0x6e5   :  { %998 = vperm.xlu1 %1232, %v995_v22  }
 0x6ed   :  { %1235 = vset.pattern.permute.xlu1 %v1416_v26 }
 0x6ee   :  { %647 = vperm.xlu1 %1235, %v1249_v23  }
 0x73d   :  { %v981_v34 = vpop.permute.xlu1 %980 }
 0x73e   :  { %v983_v32 = vsub.f32 %v1988_v4, %v981_v34  ;;  %v984_v33 = vsub.f32 %v1990_v7, %v981_v34  ;;  %v638_v4 = vmul.f32 %v636_v36, %v620_v51  ;;  %v639_v7 = vmul.f32 %v636_v36, %v621_v52 }
 0x740   :  { %v644_v55 = vmul.f32 %v642_v20, %v638_v4  ;;  %v645_v9 = vmul.f32 %v642_v20, %v639_v7 }
 0x74c   :  { %v1064_v29 = vpop.f32.mrf.mxu0  ;;  %v1084_v30 = vpop.f32.mrf.mxu1 }
 0x74d   :  { %v1085_v31 = vadd.f32 %v1084_v30, %v1064_v29 }
 0x74f   :  { %v1129_v35 = vmul.f32 0.00390625, %v1085_v31 }
 0x751   :  { %1136 = vperm.xlu2 %1233, %v1129_v35   ;;  %v1131_v45 = vmul.f32 %v1129_v35, %v1129_v35 }
 0x754   :  { %v1106_v37 = vpop.f32.mrf.mxu2  ;;  %v1126_v38 = vpop.f32.mrf.mxu3 }
 0x755   :  { %v1127_v40 = vadd.f32 %v1126_v38, %v1106_v37 }
 0x757   :  { %v1130_v41 = vmul.f32 0.00390625, %v1127_v40  ;;  %v999_v48 = vpop.permute.xlu1 %998 }
 0x758   :  { %v1001_v43 = vmul.f32 %v999_v48, %v983_v32  ;;  %v1002_v44 = vmul.f32 %v999_v48, %v984_v33 }
 0x759   :  { %v1132_v47 = vsub.f32 %v1130_v41, %v1131_v45 }
 0x75a   :  { %v1003_v18 = vmul.f32 %v1001_v43, %v2044_v12  ;;  %v1004_v21 = vmul.f32 %v1002_v44, %v2044_v12 }
 0x75b   :  { %v1133_v53 = vmax.f32 %v1132_v47, 0.0 }
 0x75c   :  { %v1005_v28 = vadd.f32 %v1003_v18, %v480_v61  ;;  %v1006_v29 = vadd.f32 %v1004_v21, %v480_v61 }
 0x75d   :  { %v1141_v3 = vadd.f32 1e-05, %v1133_v53 }
 0x75f   :  { %1247 = vrsqrt.f32 %v1141_v3  ;;  %vm1148_vm4 = vweird.f32 %v1141_v3 }
 0x760   :  { %v648_v5 = vpop.permute.xlu1 %647 }
 0x761   :  { %v650_v58 = vadd.f32 %v648_v5, %v644_v55  ;;  %v651_v24 = vadd.f32 %v648_v5, %v645_v9 }
 0x763   :  { %v652_v59 = vadd.f32 %v650_v58, %v482_v56  ;;  %v653_v25 = vadd.f32 %v651_v24, %v483_v57 }
 0x765   :  { %v1248_v60 = vpop.eup %1247  ;;  %v654_v62 = vmax.f32 %v652_v59, 0.0  ;;  %v655_v63 = vmax.f32 %v653_v25, 0.0 }
 0x766   :  { %v1143_v0 = vmul.f32 %v1248_v60, %v1141_v3  ;;  %vm1149_vm3 = vweird.f32 %v1248_v60 }
 0x767   :  { %656 = vst [vmem:[#allocation11] sm:$0xff] %v654_v62  ;;  %vm1150_vm7 = vmor %vm1148_vm4, %vm1149_vm3 }
 0x768   :  { %657 = vst [vmem:[#allocation11 + $0x8] sm:$0xff] %v655_v63  ;;  %v1144_v1 = vmul.f32 %v1248_v60, %v1143_v0 }
 0x76a   :  { %v1145_v10 = vmul.f32 0.5, %v1144_v1 }
 0x76c   :  { %v1146_v11 = vsub.f32 1.5, %v1145_v10 }
 0x76e   :  { %v1147_v2 = vmul.f32 %v1248_v60, %v1146_v11 }
 0x770   :  { %v1151_v13 = vsel %vm1150_vm7, %v1248_v60, %v1147_v2 }
 0x771   :  { %1154 = vperm.xlu2 %1233, %v1151_v13  }
 0x7ab   :  { %v1137_v14 = vpop.permute.xlu2 %1136 }
 0x7ac   :  { %v1139_v15 = vsub.f32 %v2034_v6, %v1137_v14  ;;  %v1140_v16 = vsub.f32 %v2036_v8, %v1137_v14 }
 0x7cb   :  { %v1155_v17 = vpop.permute.xlu2 %1154 }
 0x7cc   :  { %v1157_v22 = vmul.f32 %v1155_v17, %v1139_v15  ;;  %v1158_v26 = vmul.f32 %v1155_v17, %v1140_v16 }
 0x7ce   :  { %v1159_v23 = vmul.f32 %v1157_v22, %v642_v20  ;;  %v1160_v27 = vmul.f32 %v1158_v26, %v642_v20 }
 0x7d0   :  { %v1161_v30 = vadd.f32 %v1159_v23, %v648_v5  ;;  %v1162_v31 = vadd.f32 %v1160_v27, %v648_v5 }
 0x7d2   :  { %v1163_v34 = vadd.f32 %v1161_v30, %v1005_v28  ;;  %v1164_v35 = vadd.f32 %v1162_v31, %v1006_v29 }
 0x7d4   :  { %v1165_v6 = vmax.f32 %v1163_v34, 0.0  ;;  %v1166_v8 = vmax.f32 %v1164_v35, 0.0 }
 0x7d6   :  { %1168 = vst [vmem:[#allocation11 + $0x10] sm:$0xff] %v1165_v6 }
 0x7d7   :  { %1169 = vst [vmem:[#allocation11 + $0x18] sm:$0xff] %v1166_v8 }
 0x7d8   :  { %1182 = dma.vmem_to_hbm [thread:$0]  %s1175_s17, 512, %s1177_s20, [#allocation4], %s1405_s10, %s1405_s10, %s1406_s3  }
 0x7d9   :  { %1400 = dma.done.wait [#allocation4], 512  }
 0x7da   :  { %1401 = vsyncadd [#allocation4], 4294966784 }
 0x7db   :  { %1187 = vsyncpa [#allocation3], 1 }
 0x7dc   :  { %1188 = vsyncpa [#allocation6], 1 }
 0x7dd   :  { %1189 = vsyncpa [#allocation9], 1 }
 0x7de   :  { %1190 = vsyncpa [#allocation4], 1 }

</bundles_post_ra>
